<compile_context>
chip_gen: v6e
topology: v6e:2x2x1
jax: 0.10.0
libtpu: 0.0.40
codegen_flags: <defaults>
</compile_context>

<pallas_src>
import math
from functools import partial

import jax
import jax.numpy as jnp
from jax.experimental import pallas as pl
from jax.experimental.pallas import tpu as pltpu


# ----------------------------- helpers -----------------------------

def _layernorm(x, gamma, beta, eps=1e-5):
    # x: (R, D) f32; gamma/beta: (1, D) f32. Biased variance, matching nn.LayerNorm.
    mu = jnp.mean(x, axis=-1, keepdims=True)
    xc = x - mu
    var = jnp.mean(xc * xc, axis=-1, keepdims=True)
    inv = jax.lax.rsqrt(var + eps)
    return xc * inv * gamma + beta


def _default_vmem_limit():
    # ~100 MiB on 128-MiB parts (v5e/v6e), ~54 MiB on v7x's 64 MiB.
    try:
        cap = int(pltpu.get_tpu_info().vmem_capacity_bytes)
        return min(100 * 1024 * 1024, int(cap * 0.85))
    except Exception:
        return 64 * 1024 * 1024


def _largest_tile(total, unit=128, cap=1024):
    # largest multiple-of-`unit` divisor of `total` that is <= cap (else the full extent)
    if total <= cap or total % unit != 0:
        return total
    for t in range(cap - cap % unit, unit - 1, -unit):
        if total % t == 0:
            return t
    return total


# ----------------------------- fused layer-stack kernel -----------------------------

def transformer_layers_kernel(x_ref, wqkv_ref, wo_ref, w1_ref, w2_ref, vec_ref,
                              x_out_ref, *, num_heads):
    l = pl.program_id(1)

    # Load the block input once per batch tile; X then lives in the (resident)
    # output block's VMEM buffer across the whole layer loop.
    @pl.when(l == 0)
    def _():
        x_out_ref[...] = x_ref[...]

    x = x_out_ref[...]                                   # (Bb, T, D) f32
    Bb, T, D = x.shape
    H = num_heads
    Dh = D // H
    d_ff = w1_ref.shape[-1]
    scale = 1.0 / math.sqrt(float(D))                    # 1/sqrt(d_model), per reference

    x_rows = x.reshape(Bb * T, D)

    # ---- fused QKV projection: one (Bb*T, D) @ (D, 3D) matmul on the MXU ----
    qkv = jnp.dot(x_rows.astype(jnp.bfloat16), wqkv_ref[0],
                  preferred_element_type=jnp.float32).reshape(Bb, T, 3 * D)

    # ---- multi-head attention, heads batched along a LEADING axis ----
    # Head h of q/k/v is a static lane slice; stacking along axis 0 keeps the lane
    # layout intact (no 4-D transpose), so QK^T / softmax / AV run as single batched
    # ops over (H*Bb, T, ...) instead of an unrolled per-head loop.
    qh = jnp.concatenate([qkv[:, :, h * Dh:(h + 1) * Dh] for h in range(H)], axis=0)
    kh = jnp.concatenate([qkv[:, :, D + h * Dh:D + (h + 1) * Dh] for h in range(H)], axis=0)
    vh = jnp.concatenate([qkv[:, :, 2 * D + h * Dh:2 * D + (h + 1) * Dh] for h in range(H)], axis=0)
    qh = (qh * scale).astype(jnp.bfloat16)               # fold 1/sqrt(d_model) into Q
    kh = kh.astype(jnp.bfloat16)
    vh = vh.astype(jnp.bfloat16)

    s = jnp.einsum('btd,bsd->bts', qh, kh,
                   preferred_element_type=jnp.float32)    # (H*Bb, T, T) f32
    s = s - jnp.max(s, axis=-1, keepdims=True)
    e = jnp.exp(s)
    p = e * pl.reciprocal(jnp.sum(e, axis=-1, keepdims=True), approx=False)
    ctx_h = jnp.einsum('bts,bsd->btd', p.astype(jnp.bfloat16), vh,
                       preferred_element_type=jnp.float32)  # (H*Bb, T, Dh) f32

    # merge heads back to feature layout [h0 | h1 | ...] and feed Wo directly (no VMEM scratch)
    ctx = jnp.concatenate([ctx_h[h * Bb:(h + 1) * Bb] for h in range(H)], axis=-1)  # (Bb,T,D)
    ctx = ctx.reshape(Bb * T, D).astype(jnp.bfloat16)

    # ---- packed per-layer vectors: one (8, Dmax) block ----
    vec = vec_ref[0]                                      # (8, Dmax) f32
    bo, g1, be1 = vec[0:1, :D], vec[1:2, :D], vec[2:3, :D]
    b1 = vec[3:4, :d_ff]
    b2, g2, be2 = vec[4:5, :D], vec[5:6, :D], vec[6:7, :D]

    attn = jnp.dot(ctx, wo_ref[0], preferred_element_type=jnp.float32) + bo
    y = _layernorm(attn + x_rows, g1, be1)                # (Bb*T, D) f32

    # ---- feed-forward ----
    h1 = jnp.dot(y.astype(jnp.bfloat16), w1_ref[0],
                 preferred_element_type=jnp.float32) + b1
    h1 = jnp.maximum(h1, 0.0)
    ff = jnp.dot(h1.astype(jnp.bfloat16), w2_ref[0],
                 preferred_element_type=jnp.float32) + b2

    # residual with ORIGINAL block input x (exactly as in the PyTorch code), then LN2
    out = _layernorm(ff + x_rows, g2, be2)                # (Bb*T, D) f32
    x_out_ref[...] = out.reshape(Bb, T, D)


# ----------------------------- vocab projection kernel -----------------------------

def vocab_proj_kernel(x_ref, w_ref, b_ref, o_ref):
    Bb, T, D = x_ref.shape
    tv = o_ref.shape[-1]
    x = x_ref[...].reshape(Bb * T, D).astype(jnp.bfloat16)
    logits = jnp.dot(x, w_ref[...], preferred_element_type=jnp.float32) + b_ref[...]
    o_ref[...] = logits.reshape(Bb, T, tv)


# ----------------------------- wrapper -----------------------------

def transformer_forward(params, tokens, *, num_heads, batch_block=None, vocab_block=None):
    # Embedding lookup + positional embedding: glue (gather), not the hot path.
    tok_emb = jnp.take(params["tok_emb"], tokens, axis=0)                # (B, T, D)
    T = tokens.shape[1]
    x = tok_emb + params["pos_emb"][:T][None, :, :]
    B, _, D = x.shape
    L = params["wqkv"].shape[0]
    d_ff = params["w1"].shape[-1]
    V = params["w_out"].shape[-1]
    assert D % num_heads == 0

    Bb = batch_block or B
    assert B % Bb == 0
    n_bt = B // Bb

    # pack the 7 small per-layer vectors into a single (L, 8, Dmax) block (1 DMA per layer)
    Dmax = max(D, d_ff)
    def pad_last(a):
        return jnp.pad(a, ((0, 0), (0, 0), (0, Dmax - a.shape[-1])))
    vec = jnp.concatenate([pad_last(params[k]) for k in
                           ("bo", "g1", "be1", "b1", "b2", "g2", "be2")], axis=1)
    vec = jnp.pad(vec, ((0, 0), (0, 8 - vec.shape[1]), (0, 0)))          # (L, 8, Dmax)

    vmem_limit = _default_vmem_limit()

    # ---- kernel 1: fused layer stack, X resident across the "arbitrary" layer axis ----
    x_final = pl.pallas_call(
        partial(transformer_layers_kernel, num_heads=num_heads),
        out_shape=jax.ShapeDtypeStruct((B, T, D), jnp.float32),
        grid=(n_bt, L),                                   # layers innermost
        in_specs=[
            pl.BlockSpec((Bb, T, D), lambda i, l: (i, 0, 0)),
            pl.BlockSpec((1, D, 3 * D), lambda i, l: (l, 0, 0)),
            pl.BlockSpec((1, D, D), lambda i, l: (l, 0, 0)),
            pl.BlockSpec((1, D, d_ff), lambda i, l: (l, 0, 0)),
            pl.BlockSpec((1, d_ff, D), lambda i, l: (l, 0, 0)),
            pl.BlockSpec((1, 8, Dmax), lambda i, l: (l, 0, 0)),
        ],
        out_specs=pl.BlockSpec((Bb, T, D), lambda i, l: (i, 0, 0)),
        compiler_params=pltpu.CompilerParams(
            dimension_semantics=("parallel", "arbitrary"),
            vmem_limit_bytes=vmem_limit),
    )(x, params["wqkv"], params["wo"], params["w1"], params["w2"], vec)

    # ---- kernel 2: final vocab projection, tiled over the vocab dim (lane-dense tiles) ----
    tv = vocab_block or _largest_tile(V)
    assert V % tv == 0
    logits = pl.pallas_call(
        vocab_proj_kernel,
        out_shape=jax.ShapeDtypeStruct((B, T, V), jnp.float32),
        grid=(n_bt, V // tv),
        in_specs=[
            pl.BlockSpec((Bb, T, D), lambda i, j: (i, 0, 0)),
            pl.BlockSpec((D, tv), lambda i, j: (0, j)),
            pl.BlockSpec((1, tv), lambda i, j: (0, j)),
        ],
        out_specs=pl.BlockSpec((Bb, T, tv), lambda i, j: (i, 0, j)),
        compiler_params=pltpu.CompilerParams(
            dimension_semantics=("parallel", "parallel"),
            vmem_limit_bytes=vmem_limit),
    )(x_final, params["w_out"], params["b_out"])
    return logits


# ----------------------------- parameter init -----------------------------

def init_params(key, vocab_size, context_window, d_model, d_ff, num_layers):
    keys = jax.random.split(key, 3 + num_layers)

    def dense(k, shape, fan_in, dtype=jnp.bfloat16):
        return (jax.random.normal(k, shape, jnp.float32) / math.sqrt(fan_in)).astype(dtype)

    lkeys = [jax.random.split(keys[3 + i], 4) for i in range(num_layers)]
    stack = lambda make: jnp.stack([make(i) for i in range(num_layers)], axis=0)

    return {
        "tok_emb": jax.random.normal(keys[0], (vocab_size, d_model), jnp.float32) * 0.02,
        "pos_emb": jax.random.normal(keys[1], (context_window, d_model), jnp.float32) * 0.02,
        # per-layer stacked weights (leading layer axis); matmul weights in bf16
        "wqkv": stack(lambda i: dense(lkeys[i][0], (d_model, 3 * d_model), d_model)),
        "wo":   stack(lambda i: dense(lkeys[i][1], (d_model, d_model), d_model)),
        "bo":   jnp.zeros((num_layers, 1, d_model), jnp.float32),
        "g1":   jnp.ones((num_layers, 1, d_model), jnp.float32),
        "be1":  jnp.zeros((num_layers, 1, d_model), jnp.float32),
        "w1":   stack(lambda i: dense(lkeys[i][2], (d_model, d_ff), d_model)),
        "b1":   jnp.zeros((num_layers, 1, d_ff), jnp.float32),
        "w2":   stack(lambda i: dense(lkeys[i][3], (d_ff, d_model), d_ff)),
        "b2":   jnp.zeros((num_layers, 1, d_model), jnp.float32),
        "g2":   jnp.ones((num_layers, 1, d_model), jnp.float32),
        "be2":  jnp.zeros((num_layers, 1, d_model), jnp.float32),
        "w_out": dense(keys[2], (d_model, vocab_size), d_model),
        "b_out": jnp.zeros((1, vocab_size), jnp.float32),
    }


# ----------------------------- main -----------------------------

if __name__ == "__main__":
    # small, lane-aligned shapes (feature dims multiples of 128)
    vocab_size = 128
    context_window = 32
    d_model = 128
    d_ff = 256
    num_heads = 4
    num_layers = 2
    batch = 4
    seq = 16

    key = jax.random.PRNGKey(0)
    k_tok, k_params = jax.random.split(key)
    tokens = jax.random.randint(k_tok, (batch, seq), 0, vocab_size, dtype=jnp.int32)
    params = init_params(k_params, vocab_size, context_window, d_model, d_ff, num_layers)

    # batch_block=2 -> n_bt=2: exercises the "parallel" batch-tile axis (and keeps it a
    # multiple of 2 for v7x's two TensorCores). Raise Bb on real workloads (Bb*T >= 512
    # rows on v5e) as far as VMEM allows.
    fwd = jax.jit(partial(transformer_forward, num_heads=num_heads, batch_block=2))
    logits = jax.block_until_ready(fwd(params, tokens))
    assert logits.shape == (batch, seq, vocab_size)
    assert bool(jnp.all(jnp.isfinite(logits)))
    print("KERNEL_OK")
</pallas_src>

<mosaic_0001>
module attributes {stable_mosaic.version = 11 : i64} {
  func.func @vocab_proj_kernel(%arg0: i32, %arg1: i32, %arg2: memref<2x16x128xf32, #tpu.memory_space<vmem>>, %arg3: memref<128x128xbf16, #tpu.memory_space<vmem>>, %arg4: memref<1x128xf32, #tpu.memory_space<vmem>>, %arg5: memref<2x16x128xf32, #tpu.memory_space<vmem>>) attributes {dimension_semantics = [#tpu.dimension_semantics<parallel>, #tpu.dimension_semantics<parallel>], iteration_bounds = array<i64: 2, 1>, scalar_prefetch = 0 : i64, scratch_operands = 0 : i64, tpu.core_type = #tpu.core_type<tc>, window_params = [{transform_indices = @transform_0, window_bounds = array<i64: 2, 16, 128>}, {transform_indices = @transform_1, window_bounds = array<i64: 128, 128>}, {transform_indices = @transform_2, window_bounds = array<i64: 1, 128>}, {transform_indices = @transform_3, window_bounds = array<i64: 2, 16, 128>}]} {
    %c0 = arith.constant 0 : index
    %c0_0 = arith.constant 0 : index
    %c0_1 = arith.constant 0 : index
    %0 = vector.load %arg2[%c0, %c0_0, %c0_1] : memref<2x16x128xf32, #tpu.memory_space<vmem>>, vector<2x16x128xf32>
    %1 = vector.shape_cast %0 : vector<2x16x128xf32> to vector<32x128xf32>
    %2 = arith.truncf %1 : vector<32x128xf32> to vector<32x128xbf16>
    %c0_2 = arith.constant 0 : index
    %c0_3 = arith.constant 0 : index
    %3 = vector.load %arg3[%c0_2, %c0_3] : memref<128x128xbf16, #tpu.memory_space<vmem>>, vector<128x128xbf16>
    %cst = arith.constant dense<0.000000e+00> : vector<32x128xf32>
    %4 = tpu.matmul %2, %3, %cst {dimension_numbers = #tpu.dot_dimension_numbers<[1], [0], [0], [1], [0, 0, 1, 1], [], []>} : vector<32x128xbf16>, vector<128x128xbf16>, vector<32x128xf32> -> vector<32x128xf32>
    %c0_4 = arith.constant 0 : index
    %c0_5 = arith.constant 0 : index
    %5 = vector.load %arg4[%c0_4, %c0_5] : memref<1x128xf32, #tpu.memory_space<vmem>>, vector<1x128xf32>
    %6 = vector.broadcast %5 : vector<1x128xf32> to vector<32x128xf32>
    %7 = arith.addf %4, %6 : vector<32x128xf32>
    %8 = vector.shape_cast %7 : vector<32x128xf32> to vector<2x16x128xf32>
    %c0_6 = arith.constant 0 : index
    %c0_7 = arith.constant 0 : index
    %c0_8 = arith.constant 0 : index
    %9 = vector.load %arg5[%c0_6, %c0_7, %c0_8] : memref<2x16x128xf32, #tpu.memory_space<vmem>>, vector<2x16x128xf32>
    tpu.vector_store %arg5[%c0_6, %c0_7, %c0_8], %8 {strides = array<i32>} : memref<2x16x128xf32, #tpu.memory_space<vmem>>, vector<2x16x128xf32>,
    return
  }
  func.func @transform_0(%arg0: i32, %arg1: i32) -> (i32, i32, i32) {
    %c0_i32 = arith.constant 0 : i32
    %c0_i32_0 = arith.constant 0 : i32
    %c0_i32_1 = arith.constant 0 : i32
    return %arg0, %c0_i32, %c0_i32_0 : i32, i32, i32
  }
  func.func @transform_1(%arg0: i32, %arg1: i32) -> (i32, i32) {
    %c0_i32 = arith.constant 0 : i32
    %c0_i32_0 = arith.constant 0 : i32
    return %c0_i32, %arg1 : i32, i32
  }
  func.func @transform_2(%arg0: i32, %arg1: i32) -> (i32, i32) {
    %c0_i32 = arith.constant 0 : i32
    %c0_i32_0 = arith.constant 0 : i32
    return %c0_i32, %arg1 : i32, i32
  }
  func.func @transform_3(%arg0: i32, %arg1: i32) -> (i32, i32, i32) {
    %c0_i32 = arith.constant 0 : i32
    %c0_i32_0 = arith.constant 0 : i32
    return %arg0, %c0_i32, %arg1 : i32, i32, i32
  }
}

module attributes {stable_mosaic.version = 11 : i64} {
  func.func @transformer_layers_kernel(%arg0: i32, %arg1: i32, %arg2: memref<2x16x128xf32, #tpu.memory_space<vmem>>, %arg3: memref<1x128x384xbf16, #tpu.memory_space<vmem>>, %arg4: memref<1x128x128xbf16, #tpu.memory_space<vmem>>, %arg5: memref<1x128x256xbf16, #tpu.memory_space<vmem>>, %arg6: memref<1x256x128xbf16, #tpu.memory_space<vmem>>, %arg7: memref<1x8x256xf32, #tpu.memory_space<vmem>>, %arg8: memref<2x16x128xf32, #tpu.memory_space<vmem>>) attributes {dimension_semantics = [#tpu.dimension_semantics<parallel>, #tpu.dimension_semantics<arbitrary>], iteration_bounds = array<i64: 2, 2>, scalar_prefetch = 0 : i64, scratch_operands = 0 : i64, tpu.core_type = #tpu.core_type<tc>, window_params = [{transform_indices = @transform_0, window_bounds = array<i64: 2, 16, 128>}, {transform_indices = @transform_1, window_bounds = array<i64: 1, 128, 384>}, {transform_indices = @transform_2, window_bounds = array<i64: 1, 128, 128>}, {transform_indices = @transform_3, window_bounds = array<i64: 1, 128, 256>}, {transform_indices = @transform_4, window_bounds = array<i64: 1, 256, 128>}, {transform_indices = @transform_5, window_bounds = array<i64: 1, 8, 256>}, {transform_indices = @transform_6, window_bounds = array<i64: 2, 16, 128>}]} {
    %c0_i32 = arith.constant 0 : i32
    %0 = arith.cmpi eq, %arg1, %c0_i32 : i32
    %1 = arith.extui %0 : i1 to i32
    %c0_i32_0 = arith.constant 0 : i32
    %2 = arith.cmpi ne, %1, %c0_i32_0 : i32
    scf.if %2 {
      %c0_40 = arith.constant 0 : index
      %c0_41 = arith.constant 0 : index
      %c0_42 = arith.constant 0 : index
      %122 = vector.load %arg2[%c0_40, %c0_41, %c0_42] : memref<2x16x128xf32, #tpu.memory_space<vmem>>, vector<2x16x128xf32>
      %c0_43 = arith.constant 0 : index
      %c0_44 = arith.constant 0 : index
      %c0_45 = arith.constant 0 : index
      %123 = vector.load %arg8[%c0_43, %c0_44, %c0_45] : memref<2x16x128xf32, #tpu.memory_space<vmem>>, vector<2x16x128xf32>
      tpu.vector_store %arg8[%c0_43, %c0_44, %c0_45], %122 {strides = array<i32>} : memref<2x16x128xf32, #tpu.memory_space<vmem>>, vector<2x16x128xf32>,
    } else {
    }
    %c0 = arith.constant 0 : index
    %c0_1 = arith.constant 0 : index
    %c0_2 = arith.constant 0 : index
    %3 = vector.load %arg8[%c0, %c0_1, %c0_2] : memref<2x16x128xf32, #tpu.memory_space<vmem>>, vector<2x16x128xf32>
    %4 = vector.shape_cast %3 : vector<2x16x128xf32> to vector<32x128xf32>
    %5 = arith.truncf %4 : vector<32x128xf32> to vector<32x128xbf16>
    %c0_3 = arith.constant 0 : index
    %c0_4 = arith.constant 0 : index
    %c0_5 = arith.constant 0 : index
    %6 = vector.load %arg3[%c0_3, %c0_4, %c0_5] : memref<1x128x384xbf16, #tpu.memory_space<vmem>>, vector<1x128x384xbf16>
    %7 = vector.shape_cast %6 : vector<1x128x384xbf16> to vector<128x384xbf16>
    %cst = arith.constant dense<0.000000e+00> : vector<32x384xf32>
    %8 = tpu.matmul %5, %7, %cst {dimension_numbers = #tpu.dot_dimension_numbers<[1], [0], [0], [1], [0, 0, 1, 1], [], []>} : vector<32x128xbf16>, vector<128x384xbf16>, vector<32x384xf32> -> vector<32x384xf32>
    %9 = vector.shape_cast %8 : vector<32x384xf32> to vector<2x16x384xf32>
    %10 = vector.extract_strided_slice %9 {offsets = [0, 0, 0], sizes = [2, 16, 32], strides = [1, 1, 1]} : vector<2x16x384xf32> to vector<2x16x32xf32>
    %11 = vector.extract_strided_slice %9 {offsets = [0, 0, 32], sizes = [2, 16, 32], strides = [1, 1, 1]} : vector<2x16x384xf32> to vector<2x16x32xf32>
    %12 = vector.extract_strided_slice %9 {offsets = [0, 0, 64], sizes = [2, 16, 32], strides = [1, 1, 1]} : vector<2x16x384xf32> to vector<2x16x32xf32>
    %13 = vector.extract_strided_slice %9 {offsets = [0, 0, 96], sizes = [2, 16, 32], strides = [1, 1, 1]} : vector<2x16x384xf32> to vector<2x16x32xf32>
    %14 = tpu.concatenate %10, %11, %12, %13 in 0 : vector<2x16x32xf32>, vector<2x16x32xf32>, vector<2x16x32xf32>, vector<2x16x32xf32> -> vector<8x16x32xf32>
    %15 = vector.extract_strided_slice %9 {offsets = [0, 0, 128], sizes = [2, 16, 32], strides = [1, 1, 1]} : vector<2x16x384xf32> to vector<2x16x32xf32>
    %16 = vector.extract_strided_slice %9 {offsets = [0, 0, 160], sizes = [2, 16, 32], strides = [1, 1, 1]} : vector<2x16x384xf32> to vector<2x16x32xf32>
    %17 = vector.extract_strided_slice %9 {offsets = [0, 0, 192], sizes = [2, 16, 32], strides = [1, 1, 1]} : vector<2x16x384xf32> to vector<2x16x32xf32>
    %18 = vector.extract_strided_slice %9 {offsets = [0, 0, 224], sizes = [2, 16, 32], strides = [1, 1, 1]} : vector<2x16x384xf32> to vector<2x16x32xf32>
    %19 = tpu.concatenate %15, %16, %17, %18 in 0 : vector<2x16x32xf32>, vector<2x16x32xf32>, vector<2x16x32xf32>, vector<2x16x32xf32> -> vector<8x16x32xf32>
    %20 = vector.extract_strided_slice %9 {offsets = [0, 0, 256], sizes = [2, 16, 32], strides = [1, 1, 1]} : vector<2x16x384xf32> to vector<2x16x32xf32>
    %21 = vector.extract_strided_slice %9 {offsets = [0, 0, 288], sizes = [2, 16, 32], strides = [1, 1, 1]} : vector<2x16x384xf32> to vector<2x16x32xf32>
    %22 = vector.extract_strided_slice %9 {offsets = [0, 0, 320], sizes = [2, 16, 32], strides = [1, 1, 1]} : vector<2x16x384xf32> to vector<2x16x32xf32>
    %23 = vector.extract_strided_slice %9 {offsets = [0, 0, 352], sizes = [2, 16, 32], strides = [1, 1, 1]} : vector<2x16x384xf32> to vector<2x16x32xf32>
    %24 = tpu.concatenate %20, %21, %22, %23 in 0 : vector<2x16x32xf32>, vector<2x16x32xf32>, vector<2x16x32xf32>, vector<2x16x32xf32> -> vector<8x16x32xf32>
    %cst_6 = arith.constant 0.0883883461 : f32
    %25 = vector.broadcast %cst_6 : f32 to vector<8x16x32xf32>
    %26 = arith.mulf %14, %25 : vector<8x16x32xf32>
    %27 = arith.truncf %26 : vector<8x16x32xf32> to vector<8x16x32xbf16>
    %28 = arith.truncf %19 : vector<8x16x32xf32> to vector<8x16x32xbf16>
    %29 = arith.truncf %24 : vector<8x16x32xf32> to vector<8x16x32xbf16>
    "tpu.trace_start"() <{level = 10 : i32, message = "btd,bsd->bts"}> : () -> ()
    %cst_7 = arith.constant dense<0.000000e+00> : vector<8x16x16xf32>
    %30 = tpu.matmul %27, %28, %cst_7 {dimension_numbers = #tpu.dot_dimension_numbers<[2], [2], [1], [1], [0, 0, 0, 1, 1, 1], [0], [0]>} : vector<8x16x32xbf16>, vector<8x16x32xbf16>, vector<8x16x16xf32> -> vector<8x16x16xf32>
    "tpu.trace_stop"() : () -> ()
    %cst_8 = arith.constant dense<0xFF800000> : vector<8x16xf32>
    %31 = vector.multi_reduction <maximumf>, %30, %cst_8 [2] : vector<8x16x16xf32> to vector<8x16xf32>
    %32 = vector.shape_cast %31 : vector<8x16xf32> to vector<8x16x1xf32>
    %33 = vector.broadcast %32 : vector<8x16x1xf32> to vector<8x16x16xf32>
    %34 = arith.subf %30, %33 : vector<8x16x16xf32>
    %35 = math.exp %34 : vector<8x16x16xf32>
    %cst_9 = arith.constant dense<0.000000e+00> : vector<8x16xf32>
    %36 = vector.multi_reduction <add>, %35, %cst_9 [2] : vector<8x16x16xf32> to vector<8x16xf32>
    %37 = vector.shape_cast %36 : vector<8x16xf32> to vector<8x16x1xf32>
    %38 = tpu.reciprocal %37 : vector<8x16x1xf32> -> vector<8x16x1xf32>
    %39 = vector.broadcast %38 : vector<8x16x1xf32> to vector<8x16x16xf32>
    %40 = arith.mulf %35, %39 : vector<8x16x16xf32>
    %41 = arith.truncf %40 : vector<8x16x16xf32> to vector<8x16x16xbf16>
    "tpu.trace_start"() <{level = 10 : i32, message = "bts,bsd->btd"}> : () -> ()
    %cst_10 = arith.constant dense<0.000000e+00> : vector<8x16x32xf32>
    %42 = tpu.matmul %41, %29, %cst_10 {dimension_numbers = #tpu.dot_dimension_numbers<[2], [1], [1], [2], [0, 0, 0, 1, 1, 2], [0], [0]>} : vector<8x16x16xbf16>, vector<8x16x32xbf16>, vector<8x16x32xf32> -> vector<8x16x32xf32>
    "tpu.trace_stop"() : () -> ()
    %43 = vector.extract_strided_slice %42 {offsets = [0, 0, 0], sizes = [2, 16, 32], strides = [1, 1, 1]} : vector<8x16x32xf32> to vector<2x16x32xf32>
    %44 = vector.extract_strided_slice %42 {offsets = [2, 0, 0], sizes = [2, 16, 32], strides = [1, 1, 1]} : vector<8x16x32xf32> to vector<2x16x32xf32>
    %45 = vector.extract_strided_slice %42 {offsets = [4, 0, 0], sizes = [2, 16, 32], strides = [1, 1, 1]} : vector<8x16x32xf32> to vector<2x16x32xf32>
    %46 = vector.extract_strided_slice %42 {offsets = [6, 0, 0], sizes = [2, 16, 32], strides = [1, 1, 1]} : vector<8x16x32xf32> to vector<2x16x32xf32>
    %47 = tpu.concatenate %43, %44, %45, %46 in 2 : vector<2x16x32xf32>, vector<2x16x32xf32>, vector<2x16x32xf32>, vector<2x16x32xf32> -> vector<2x16x128xf32>
    %48 = vector.shape_cast %47 : vector<2x16x128xf32> to vector<32x128xf32>
    %49 = arith.truncf %48 : vector<32x128xf32> to vector<32x128xbf16>
    %c0_11 = arith.constant 0 : index
    %c0_12 = arith.constant 0 : index
    %c0_13 = arith.constant 0 : index
    %50 = vector.load %arg7[%c0_11, %c0_12, %c0_13] : memref<1x8x256xf32, #tpu.memory_space<vmem>>, vector<1x8x256xf32>
    %51 = vector.shape_cast %50 : vector<1x8x256xf32> to vector<8x256xf32>
    %52 = vector.extract_strided_slice %51 {offsets = [0, 0], sizes = [1, 128], strides = [1, 1]} : vector<8x256xf32> to vector<1x128xf32>
    %53 = vector.extract_strided_slice %51 {offsets = [1, 0], sizes = [1, 128], strides = [1, 1]} : vector<8x256xf32> to vector<1x128xf32>
    %54 = vector.extract_strided_slice %51 {offsets = [2, 0], sizes = [1, 128], strides = [1, 1]} : vector<8x256xf32> to vector<1x128xf32>
    %55 = vector.extract_strided_slice %51 {offsets = [3, 0], sizes = [1, 256], strides = [1, 1]} : vector<8x256xf32> to vector<1x256xf32>
    %56 = vector.extract_strided_slice %51 {offsets = [4, 0], sizes = [1, 128], strides = [1, 1]} : vector<8x256xf32> to vector<1x128xf32>
    %57 = vector.extract_strided_slice %51 {offsets = [5, 0], sizes = [1, 128], strides = [1, 1]} : vector<8x256xf32> to vector<1x128xf32>
    %58 = vector.extract_strided_slice %51 {offsets = [6, 0], sizes = [1, 128], strides = [1, 1]} : vector<8x256xf32> to vector<1x128xf32>
    %c0_14 = arith.constant 0 : index
    %c0_15 = arith.constant 0 : index
    %c0_16 = arith.constant 0 : index
    %59 = vector.load %arg4[%c0_14, %c0_15, %c0_16] : memref<1x128x128xbf16, #tpu.memory_space<vmem>>, vector<1x128x128xbf16>
    %60 = vector.shape_cast %59 : vector<1x128x128xbf16> to vector<128x128xbf16>
    %cst_17 = arith.constant dense<0.000000e+00> : vector<32x128xf32>
    %61 = tpu.matmul %49, %60, %cst_17 {dimension_numbers = #tpu.dot_dimension_numbers<[1], [0], [0], [1], [0, 0, 1, 1], [], []>} : vector<32x128xbf16>, vector<128x128xbf16>, vector<32x128xf32> -> vector<32x128xf32>
    %62 = vector.broadcast %52 : vector<1x128xf32> to vector<32x128xf32>
    %63 = arith.addf %61, %62 : vector<32x128xf32>
    %64 = arith.addf %63, %4 : vector<32x128xf32>
    %cst_18 = arith.constant dense<0.000000e+00> : vector<32xf32>
    %65 = vector.multi_reduction <add>, %64, %cst_18 [1] : vector<32x128xf32> to vector<32xf32>
    %66 = vector.shape_cast %65 : vector<32xf32> to vector<32x1xf32>
    %cst_19 = arith.constant 1.280000e+02 : f32
    %67 = vector.broadcast %cst_19 : f32 to vector<32x1xf32>
    %68 = arith.divf %66, %67 : vector<32x1xf32>
    %69 = vector.broadcast %68 : vector<32x1xf32> to vector<32x128xf32>
    %70 = arith.subf %64, %69 : vector<32x128xf32>
    %71 = arith.mulf %70, %70 : vector<32x128xf32>
    %cst_20 = arith.constant dense<0.000000e+00> : vector<32xf32>
    %72 = vector.multi_reduction <add>, %71, %cst_20 [1] : vector<32x128xf32> to vector<32xf32>
    %73 = vector.shape_cast %72 : vector<32xf32> to vector<32x1xf32>
    %cst_21 = arith.constant 1.280000e+02 : f32
    %74 = vector.broadcast %cst_21 : f32 to vector<32x1xf32>
    %75 = arith.divf %73, %74 : vector<32x1xf32>
    %cst_22 = arith.constant 9.99999974E-6 : f32
    %76 = vector.broadcast %cst_22 : f32 to vector<32x1xf32>
    %77 = arith.addf %75, %76 : vector<32x1xf32>
    %78 = math.rsqrt %77 : vector<32x1xf32>
    %79 = vector.broadcast %78 : vector<32x1xf32> to vector<32x128xf32>
    %80 = arith.mulf %70, %79 : vector<32x128xf32>
    %81 = vector.broadcast %53 : vector<1x128xf32> to vector<32x128xf32>
    %82 = arith.mulf %80, %81 : vector<32x128xf32>
    %83 = vector.broadcast %54 : vector<1x128xf32> to vector<32x128xf32>
    %84 = arith.addf %82, %83 : vector<32x128xf32>
    %85 = arith.truncf %84 : vector<32x128xf32> to vector<32x128xbf16>
    %c0_23 = arith.constant 0 : index
    %c0_24 = arith.constant 0 : index
    %c0_25 = arith.constant 0 : index
    %86 = vector.load %arg5[%c0_23, %c0_24, %c0_25] : memref<1x128x256xbf16, #tpu.memory_space<vmem>>, vector<1x128x256xbf16>
    %87 = vector.shape_cast %86 : vector<1x128x256xbf16> to vector<128x256xbf16>
    %cst_26 = arith.constant dense<0.000000e+00> : vector<32x256xf32>
    %88 = tpu.matmul %85, %87, %cst_26 {dimension_numbers = #tpu.dot_dimension_numbers<[1], [0], [0], [1], [0, 0, 1, 1], [], []>} : vector<32x128xbf16>, vector<128x256xbf16>, vector<32x256xf32> -> vector<32x256xf32>
    %89 = vector.broadcast %55 : vector<1x256xf32> to vector<32x256xf32>
    %90 = arith.addf %88, %89 : vector<32x256xf32>
    %cst_27 = arith.constant 0.000000e+00 : f32
    %91 = vector.broadcast %cst_27 : f32 to vector<32x256xf32>
    %92 = arith.maximumf %90, %91 : vector<32x256xf32>
    %93 = arith.truncf %92 : vector<32x256xf32> to vector<32x256xbf16>
    %c0_28 = arith.constant 0 : index
    %c0_29 = arith.constant 0 : index
    %c0_30 = arith.constant 0 : index
    %94 = vector.load %arg6[%c0_28, %c0_29, %c0_30] : memref<1x256x128xbf16, #tpu.memory_space<vmem>>, vector<1x256x128xbf16>
    %95 = vector.shape_cast %94 : vector<1x256x128xbf16> to vector<256x128xbf16>
    %cst_31 = arith.constant dense<0.000000e+00> : vector<32x128xf32>
    %96 = tpu.matmul %93, %95, %cst_31 {dimension_numbers = #tpu.dot_dimension_numbers<[1], [0], [0], [1], [0, 0, 1, 1], [], []>} : vector<32x256xbf16>, vector<256x128xbf16>, vector<32x128xf32> -> vector<32x128xf32>
    %97 = vector.broadcast %56 : vector<1x128xf32> to vector<32x128xf32>
    %98 = arith.addf %96, %97 : vector<32x128xf32>
    %99 = arith.addf %98, %4 : vector<32x128xf32>
    %cst_32 = arith.constant dense<0.000000e+00> : vector<32xf32>
    %100 = vector.multi_reduction <add>, %99, %cst_32 [1] : vector<32x128xf32> to vector<32xf32>
    %101 = vector.shape_cast %100 : vector<32xf32> to vector<32x1xf32>
    %cst_33 = arith.constant 1.280000e+02 : f32
    %102 = vector.broadcast %cst_33 : f32 to vector<32x1xf32>
    %103 = arith.divf %101, %102 : vector<32x1xf32>
    %104 = vector.broadcast %103 : vector<32x1xf32> to vector<32x128xf32>
    %105 = arith.subf %99, %104 : vector<32x128xf32>
    %106 = arith.mulf %105, %105 : vector<32x128xf32>
    %cst_34 = arith.constant dense<0.000000e+00> : vector<32xf32>
    %107 = vector.multi_reduction <add>, %106, %cst_34 [1] : vector<32x128xf32> to vector<32xf32>
    %108 = vector.shape_cast %107 : vector<32xf32> to vector<32x1xf32>
    %cst_35 = arith.constant 1.280000e+02 : f32
    %109 = vector.broadcast %cst_35 : f32 to vector<32x1xf32>
    %110 = arith.divf %108, %109 : vector<32x1xf32>
    %cst_36 = arith.constant 9.99999974E-6 : f32
    %111 = vector.broadcast %cst_36 : f32 to vector<32x1xf32>
    %112 = arith.addf %110, %111 : vector<32x1xf32>
    %113 = math.rsqrt %112 : vector<32x1xf32>
    %114 = vector.broadcast %113 : vector<32x1xf32> to vector<32x128xf32>
    %115 = arith.mulf %105, %114 : vector<32x128xf32>
    %116 = vector.broadcast %57 : vector<1x128xf32> to vector<32x128xf32>
    %117 = arith.mulf %115, %116 : vector<32x128xf32>
    %118 = vector.broadcast %58 : vector<1x128xf32> to vector<32x128xf32>
    %119 = arith.addf %117, %118 : vector<32x128xf32>
    %120 = vector.shape_cast %119 : vector<32x128xf32> to vector<2x16x128xf32>
    %c0_37 = arith.constant 0 : index
    %c0_38 = arith.constant 0 : index
    %c0_39 = arith.constant 0 : index
    %121 = vector.load %arg8[%c0_37, %c0_38, %c0_39] : memref<2x16x128xf32, #tpu.memory_space<vmem>>, vector<2x16x128xf32>
    tpu.vector_store %arg8[%c0_37, %c0_38, %c0_39], %120 {strides = array<i32>} : memref<2x16x128xf32, #tpu.memory_space<vmem>>, vector<2x16x128xf32>,
    return
  }
  func.func @transform_0(%arg0: i32, %arg1: i32) -> (i32, i32, i32) {
    %c0_i32 = arith.constant 0 : i32
    %c0_i32_0 = arith.constant 0 : i32
    %c0_i32_1 = arith.constant 0 : i32
    return %arg0, %c0_i32, %c0_i32_0 : i32, i32, i32
  }
  func.func @transform_1(%arg0: i32, %arg1: i32) -> (i32, i32, i32) {
    %c0_i32 = arith.constant 0 : i32
    %c0_i32_0 = arith.constant 0 : i32
    %c0_i32_1 = arith.constant 0 : i32
    return %arg1, %c0_i32, %c0_i32_0 : i32, i32, i32
  }
  func.func @transform_2(%arg0: i32, %arg1: i32) -> (i32, i32, i32) {
    %c0_i32 = arith.constant 0 : i32
    %c0_i32_0 = arith.constant 0 : i32
    %c0_i32_1 = arith.constant 0 : i32
    return %arg1, %c0_i32, %c0_i32_0 : i32, i32, i32
  }
  func.func @transform_3(%arg0: i32, %arg1: i32) -> (i32, i32, i32) {
    %c0_i32 = arith.constant 0 : i32
    %c0_i32_0 = arith.constant 0 : i32
    %c0_i32_1 = arith.constant 0 : i32
    return %arg1, %c0_i32, %c0_i32_0 : i32, i32, i32
  }
  func.func @transform_4(%arg0: i32, %arg1: i32) -> (i32, i32, i32) {
    %c0_i32 = arith.constant 0 : i32
    %c0_i32_0 = arith.constant 0 : i32
    %c0_i32_1 = arith.constant 0 : i32
    return %arg1, %c0_i32, %c0_i32_0 : i32, i32, i32
  }
  func.func @transform_5(%arg0: i32, %arg1: i32) -> (i32, i32, i32) {
    %c0_i32 = arith.constant 0 : i32
    %c0_i32_0 = arith.constant 0 : i32
    %c0_i32_1 = arith.constant 0 : i32
    return %arg1, %c0_i32, %c0_i32_0 : i32, i32, i32
  }
  func.func @transform_6(%arg0: i32, %arg1: i32) -> (i32, i32, i32) {
    %c0_i32 = arith.constant 0 : i32
    %c0_i32_0 = arith.constant 0 : i32
    %c0_i32_1 = arith.constant 0 : i32
    return %arg0, %c0_i32, %c0_i32_0 : i32, i32, i32
  }
}

</mosaic_0001>

<bundles_post_ra>
// kernel: transformer_forward.3
= control target key start
LH: loop header
LB: loop body
LE: loop exit
PB: predicated region body
PF: predicated region fallthrough
CT: control target
= control target key end

     0   :  { %8 = vsyncpa [#allocation3], 0  ;;  %s831_s0 = inlined_call_operand.vmem [shape: f32[4,16,128], index: 0, kind: input, shape index: {}]   ;;  %s832_s1 = inlined_call_operand.vmem [shape: bf16[128,128], index: 1, kind: input, shape index: {}]   ;;  %s833_s2 = inlined_call_operand.vmem [shape: f32[1,128], index: 2, kind: input, shape index: {}]   ;;  %s834_s3 = inlined_call_operand.hbm [shape: f32[4,16,128], index: 3, kind: output, shape index: {}]  }
   0x1   :  { %10 = vsyncpa [#allocation3 + $0x1], 0  ;;  %s691_s12 = smov 0   ;;  %s693_s13 = smov 0  }
   0x2   :  { %s695_s14 = smov 0   ;;  %s697_s15 = smov 0  }
   0x3   :  { %s699_s16 = smov 0   ;;  %s701_s17 = smov 0  }
   0x4 LB: > { %s466_s18 = sadd.s32 4294967295, %s666_s17   ;;  %s467_s19 = sadd.s32 4294967294, %s666_s17   ;;  %s666_s17 = sphi %s701_s17, %s16_s17   ;;  %s662_s16 = sphi %s699_s16, %s841_s16   ;;  %s658_s15 = sphi %s697_s15, %s840_s15   ;;  %s654_s14 = sphi %s695_s14, %s839_s14   ;;  %s650_s13 = sphi %s693_s13, %s838_s13   ;;  %s646_s12 = sphi %s691_s12, %s837_s12  }
   0x5   : > { %s28_s20 = sadd.s32 1, %s662_s16  ;;  %s115_s21 = sadd.s32 1, %s654_s14 }
   0x6   : > { %p30_p0 = scmp.ge.s32.totalorder %s28_s20, 2  ;;  %p125_p1 = scmp.ne.s32.totalorder %s654_s14, %s650_s13 }
   0x7   : > { %p126_p2 = scmp.eq.s32.totalorder %s466_s18, 1  ;;  %p131_p3 = scmp.ne.s32.totalorder %s650_s13, %s646_s12 }
   0x8   : > { %s843_s20 = smov (%p30_p0, %s28_s20), 0  ;;  %p132_p5 = scmp.eq.s32.totalorder %s467_s19, 1 }
   0x9   : > { %p731_p4 = por %p126_p2, %p125_p1  ;;  %s110_s23 = ssub.s32 %s662_s16, %s843_s20 }
   0xa   : > { %p472_p6 = scmp.ge.s32.totalorder %s666_s17, 1  ;;  %p113_p7 = scmp.eq.s32.totalorder %s110_s23, 0 }
   0xb   : > { %p738_p8 = por %p132_p5, %p131_p3  ;;  %p173_p9 = scmp.lt.s32.totalorder %s666_s17, 3 }
   0xc   : > { %s744_s25 = scalar_select %p113_p7, %s654_s14, %s115_s21  }
   0xd   : > { %p174_p10 = pnand %p472_p6, %p173_p9 }
   0xe   : > { %s474_s28 = sshll.u32 (!%p174_p10), %s658_s15, 1  ;;  %s202_s30 = sand.u32 (!%p174_p10), 1, %s650_s13  }
   0xf   : > { %177 = sbr.rel (%p174_p10) target bundleno = 268 (0x10c), region = 32  ;;  %p206_p11 = scmp.lt.s32.totalorder (!%p174_p10), %s474_s28, 3 }
  0x10   : > { %s473_s4 = sshll.u32 (!%p174_p10), %s202_s30, 5  ;;  %s494_s10 = sshll.u32 (!%p174_p10), %s658_s15, 9 }
  0x11   : > { %s204_s7 = scalar_lea.vmem (!%p174_p10), [#allocation2], %s473_s4  ;;  %s784_s18 = scalar_lea.hbm (!%p174_p10), %s834_s3, %s494_s10 }
  0x12   : > { %s367_s8 = sshll.u32 (!%p174_p10), %s204_s7, 4  ;;  %s786_s19 = scalar_lea.sflag (!%p174_p10), [#allocation3], %s202_s30  ;;  %s779_s8 = int_to_ptr.vmem [resolvable:$true] %s367_s8 }
  0x13   : > { %s590_s15 = scalar_lea.vmem (!%p174_p10), %s779_s8, 512  ;;  %s668_s21 = smov (!%p174_p10), [#allocation2]  }
  0x14   : > { %v582_v0 = vld [vmem:[%s832_s1 + $0x38] sm:$0xff]   ;;  %v583_v1 = vld [vmem:[%s832_s1 + $0x30] sm:$0xff]   ;;  %s845_s28 = smov (!%p206_p11, %s474_s28), 3  ;;  %v584_v2 = vld [vmem:[%s832_s1 + $0x28] sm:$0xff]   ;;  %p591_p12 = scmp.ne.s32.totalorder %s779_s8, %s590_s15 }
  0x15   : > { %505 = vmatprep.subr.bf16.mxu0 %v582_v0  ;;  %s492_s6 = sshll.u32 %s845_s28, 4  ;;  %v585_v3 = vld [vmem:[%s832_s1 + $0x20] sm:$0xff]   ;;  %v586_v7 = vld [vmem:[%s832_s1 + $0x18] sm:$0xff]   ;;  %v587_v8 = vld [vmem:[%s832_s1 + $0x10] sm:$0xff]   ;;  %s594_s23 = sshll.u32 %s668_s21, 4  ;;  %s595_s23 = int_to_ptr.vmem [resolvable:$false] %s594_s23 }
  0x16   : > { %506 = vmatpush3.bf16.msra.mxu0 %v582_v0  ;;  %s210_s9 = scalar_lea.vmem %s831_s0, %s492_s6  ;;  %v588_v9 = vld [vmem:[%s832_s1 + $0x8] sm:$0xff]   ;;  %v589_v10 = vld [vmem:[%s832_s1] sm:$0xff]   ;;  %p592_p13 = pnand %p591_p12, %p731_p4 }
  0x17   : > { %507 = vmatprep.subr.bf16.mxu0 %v583_v1  ;;  %v221_v4 = vld [vmem:[%s210_s9] sm:$0xff]  ;;  %v222_v5 = vld [vmem:[%s210_s9 + $0x8] sm:$0xff]  ;;  %v223_v11 = vld [vmem:[%s210_s9 + $0x10] sm:$0xff]  ;;  %s596_s26 = scalar_lea.vmem %s595_s23, 1024  ;;  %p597_p1 = scmp.lt.s32.totalorder %s779_s8, %s595_s23 }
  0x18   : > { %v225_v6 = vpack.c.bf16 %v222_v5, %v221_v4  ;;  %v224_v12 = vld [vmem:[%s210_s9 + $0x18] sm:$0xff]  ;;  %v477_v14 = vld [vmem:[%s833_s2] ss:$0 sm:$0xff]  ;;  %p593_p0 = pneg %p592_p13  ;;  %p598_p2 = scmp.lt.s32.totalorder %s596_s26, %s590_s15 }
  0x19   : > { %v226_v13 = vpack.c.bf16 %v224_v12, %v223_v11 }
  0x1a   : > { %508 = vmatpush3.bf16.msra.mxu0 %v583_v1  ;;  %521 = vmatprep.mubr.bf16.mxu0 %v225_v6  ;;  %p599_p3 = por %p598_p2, %p597_p1 }
  0x1b   : > { %509 = vmatprep.subr.bf16.mxu0 %v584_v2 }
  0x1c   : > { %p600_p5 = pnand %p599_p3, %p593_p0 }
  0x1e   : > { %510 = vmatpush3.bf16.msra.mxu0 %v584_v2 }
  0x1f   : > { %511 = vmatprep.subr.bf16.mxu0 %v585_v3 }
  0x22   : > { %512 = vmatpush3.bf16.msra.mxu0 %v585_v3 }
  0x23   : > { %513 = vmatprep.subr.bf16.mxu0 %v586_v7 }
  0x26   : > { %514 = vmatpush3.bf16.msra.mxu0 %v586_v7 }
  0x27   : > { %515 = vmatprep.subr.bf16.mxu0 %v587_v8 }
  0x2a   : > { %516 = vmatpush3.bf16.msra.mxu0 %v587_v8 }
  0x2b   : > { %517 = vmatprep.subr.bf16.mxu0 %v588_v9 }
  0x2e   : > { %518 = vmatpush3.bf16.msra.mxu0 %v588_v9 }
  0x2f   : > { %519 = vmatprep.subr.bf16.mxu0 %v589_v10 }
  0x32   : > { %520 = vmatpush3.bf16.msra.mxu0 %v589_v10 }
  0x35   : > { %522 = vmatmul.mubr.bf16.vlgmr.msra.gmra.mxu0 %v226_v13 }
  0xf5   : > { %v523_v15 = vpop.f32.mrf.mxu0 }
  0xf6   : > { %v341_v16 = vadd.f32 %v523_v15, %v477_v14 }
  0xf7   : > { %v332_v17 = vpop.f32.mrf.mxu0 }
  0xf8   : > { %349 = vst [vmem:[%s204_s7 + $0x10] sm:$0xff] %v341_v16  ;;  %v333_v18 = vadd.f32 %v477_v14, %v332_v17 }
  0xf9   : > { %v524_v19 = vpop.f32.mrf.mxu0 }
  0xfa   : > { %347 = vst [vmem:[%s204_s7] sm:$0xff] %v333_v18  ;;  %v344_v20 = vadd.f32 %v524_v19, %v477_v14 }
  0xfb   : > { %v335_v21 = vpop.f32.mrf.mxu0 }
  0xfc   : > { %350 = vst [vmem:[%s204_s7 + $0x18] sm:$0xff] %v344_v20  ;;  %v336_v22 = vadd.f32 %v477_v14, %v335_v21 }
  0xfe   : > { %348 = vst [vmem:[%s204_s7 + $0x8] sm:$0xff] %v336_v22 }
  0xff   : > { %603 = shalt.err (!%p600_p5)
}
 0x100   : > { %s604_s27 = scalar_lea.hbm %s784_s18, 512  ;;  %s608_s30 = scalar_lea.hbm %s834_s3, 1024 }
 0x101   : > { %p605_p6 = scmp.ne.s32.totalorder %s784_s18, %s604_s27  ;;  %p609_p10 = scmp.lt.s32.totalorder %s784_s18, %s834_s3 }
 0x102   : > { %p610_p11 = scmp.lt.s32.totalorder %s608_s30, %s604_s27 }
 0x103   : > { %p606_p7 = pnand %p605_p6, %p731_p4 }
 0x104   : > { %p611_p12 = por %p610_p11, %p609_p10 }
 0x105   : > { %p607_p9 = pneg %p606_p7 }
 0x107   : > { %p612_p13 = pnand %p611_p12, %p607_p9 }
 0x109   : > { %615 = shalt.err (!%p612_p13)
}
 0x10a   : > { %s669_s6 = smov 128   ;;  %s670_s7 = smov 8  }
 0x10b   : > { %525 = dma.vmem_to_hbm [thread:$0]  (%p731_p4), %s779_s8, 512, %s784_s18, %s786_s19, %s669_s6, %s669_s6, %s670_s7  }
 0x10c PF: > { %p531_p0 = scmp.ge.s32.totalorder %s666_s17, 2  ;;  %s382_s10 = sand.u32 1, %s646_s12  }
 0x10d   : > { %s383_s9 = scalar_lea.sflag [#allocation3], %s382_s10 }
 0x10e   : > { %p528_p1 = pnand %p531_p0, %p738_p8 }
 0x110   : > { %p529_p2 = pneg %p528_p1 }
 0x112   : > { %641 = dma.done.wait (%p529_p2), %s383_s9, 512  }
 0x113   : > { %643 = vsyncadd (%p529_p2), %s383_s9, 4294966784  ;;  %s16_s17 = sadd.s32 1, %s666_s17   ;;  %s837_s12 = smov %s650_s13 }
 0x114   : > { %p13_p3 = scmp.ge.s32.totalorder %s16_s17, 4   ;;  %s838_s13 = smov %s654_s14 }
 0x115   : > { %s839_s14 = smov %s744_s25  ;;  %s840_s15 = smov %s662_s16 }
 0x116   : > { %s841_s16 = smov %s843_s20  ;;  %15 = sbr.rel (!%p13_p3) target bundleno = 4 (0x4), region = 73 }
 0x11b   :  { %388 = vsyncpa [#allocation3], 1 }
 0x11c   :  { %390 = vsyncpa [#allocation3 + $0x1], 1 }

// kernel: transformer_forward.2
= control target key start
LH: loop header
LB: loop body
LE: loop exit
PB: predicated region body
PF: predicated region fallthrough
CT: control target
= control target key end

     0   :  { %s3950_s0 = inlined_call_operand.vmem [shape: f32[4,16,128], index: 0, kind: input, shape index: {}]   ;;  %s3951_s1 = inlined_call_operand.vmem [shape: bf16[2,128,384], index: 1, kind: input, shape index: {}]   ;;  %s3952_s2 = inlined_call_operand.hbm [shape: bf16[2,128,128], index: 2, kind: input, shape index: {}]   ;;  %s3953_s3 = inlined_call_operand.vmem [shape: bf16[2,128,256], index: 3, kind: input, shape index: {}]   ;;  %s3954_s4 = inlined_call_operand.vmem [shape: bf16[2,256,128], index: 4, kind: input, shape index: {}]   ;;  %s3955_s5 = inlined_call_operand.vmem [shape: f32[2,8,256], index: 5, kind: input, shape index: {}]   ;;  %s3956_s6 = inlined_call_operand.vmem [shape: f32[4,16,128], index: 6, kind: output, shape index: {}]  }
   0x1   :  { %3960 = sst [smem:[#allocation9_spill]] %s3952_s2 }
   0x2   :  { %3961 = sst [smem:[#allocation10_spill]] %s3953_s3 }
   0x3   :  { %11 = vsyncpa [#allocation3], 0 }
   0x4   :  { %13 = vsyncpa [#allocation3 + $0x1], 0  ;;  %s3357_s21 = smov 0   ;;  %s3359_s22 = smov 0  }
   0x5   :  { %s3361_s23 = smov 0   ;;  %s3363_s24 = smov 0  }
   0x6   :  { %s3365_s25 = smov 0   ;;  %s3367_s26 = smov 0  }
   0x7   :  { %s3369_s27 = smov 0   ;;  %s3371_s28 = smov 0  }
   0x8 LB: > { %3962 = sst [smem:[#allocation5_spill]] %s3303_s26  ;;  %s2556_s29 = sadd.s32 4294967295, %s3311_s28   ;;  %s3311_s28 = sphi %s3371_s28, %s19_s28   ;;  %s3307_s27 = sphi %s3369_s27, %s3974_s27   ;;  %s3303_s26 = sphi %s3367_s26, %s3973_s26   ;;  %s3299_s25 = sphi %s3365_s25, %s3972_s25   ;;  %s3295_s24 = sphi %s3363_s24, %s3971_s24   ;;  %s3291_s23 = sphi %s3361_s23, %s3977_s23   ;;  %s3287_s22 = sphi %s3359_s22, %s3976_s22   ;;  %s3283_s21 = sphi %s3357_s21, %s3975_s21  }
   0x9   : > { %3963 = sst [smem:[#allocation6_spill]] %s3307_s27  ;;  %s28_s30 = sadd.s32 1, %s3303_s26 }
   0xa   : > { %p29_p0 = scmp.ge.s32.totalorder %s28_s30, 2  ;;  %s31_s7 = sadd.s32 1, %s3307_s27 }
   0xb   : > { %s90_s8 = sadd.s32 1, %s3291_s23  ;;  %p97_p1 = scmp.ne.s32.totalorder %s3291_s23, %s3287_s22 }
   0xc   : > { %s3979_s30 = smov (%p29_p0, %s28_s30), 0  ;;  %s3981_s7 = smov (!%p29_p0, %s31_s7), %s3307_s27 }
   0xd   : > { %3964 = sst [smem:[#allocation7_spill]] %s3979_s30  ;;  %s87_s9 = ssub.s32 %s3303_s26, %s3979_s30 }
   0xe   : > { %p98_p2 = scmp.eq.s32.totalorder %s3311_s28, 0  ;;  %p33_p3 = scmp.ge.s32.totalorder %s3981_s7, 2 }
   0xf   : > { %p88_p4 = scmp.eq.s32.totalorder %s87_s9, 0  ;;  %p103_p6 = scmp.ne.s32.totalorder %s3287_s22, %s3283_s21 }
  0x10   : > { %p3407_p5 = por %p98_p2, %p97_p1  ;;  %s3983_s7 = smov (%p33_p3, %s3981_s7), 0 }
  0x11   : > { %3966 = sst [smem:[#allocation8_spill]] %s3983_s7  ;;  %p104_p7 = scmp.eq.s32.totalorder %s2556_s29, 0 }
  0x12   : > { %s3415_s11 = scalar_select %p88_p4, %s3291_s23, %s90_s8  }
  0x13   : > { %p2890_p8 = scmp.lt.s32.totalorder %s3311_s28, 4  ;;  %s249_s12 = sand.u32 1, %s3291_s23  }
  0x14   : > { %p3419_p9 = por %p104_p7, %p103_p6  ;;  %s2560_s14 = sshll.u32 %s249_s12, 6 }
  0x15   : > { %s2661_s15 = sshll.u32 %s3303_s26, 10  ;;  %s3968_s2 = sld [smem:[#allocation9_spill]] }
  0x16   : > { %s253_s19 = scalar_lea.vmem [#allocation2], %s2560_s14  ;;  %p3429_p10 = pnand %p2890_p8, %p3407_p5 }
  0x17   : > { %s260_s20 = sshll.u32 %s253_s19, 4  ;;  %s250_s29 = scalar_lea.sflag [#allocation3], %s249_s12  ;;  %s261_s20 = int_to_ptr.vmem [resolvable:$true] %s260_s20 }
  0x18   : > { %p3219_p11 = pneg %p3429_p10  ;;  %s3230_s8 = scalar_lea.vmem %s261_s20, 1024 }
  0x19   : > { %p3231_p12 = scmp.ne.s32.totalorder %s261_s20, %s3230_s8  ;;  %s3313_s9 = smov [#allocation2]  }
  0x1a   : > { %s3235_s7 = sshll.u32 %s3313_s9, 4  ;;  %s3236_s7 = int_to_ptr.vmem [resolvable:$false] %s3235_s7 }
  0x1b   : > { %s259_s18 = scalar_lea.hbm %s3968_s2, %s2661_s15  ;;  %p3233_p13 = pnand %p3231_p12, %p3219_p11 }
  0x1c   : > { %s3237_s15 = scalar_lea.vmem %s3236_s7, 2048  ;;  %p3238_p1 = scmp.lt.s32.totalorder %s261_s20, %s3236_s7 }
  0x1d   : > { %p3234_p0 = pneg %p3233_p13  ;;  %p3239_p2 = scmp.lt.s32.totalorder %s3237_s15, %s3230_s8 }
  0x1f   : > { %p3240_p3 = por %p3239_p2, %p3238_p1 }
  0x21   : > { %p3241_p4 = pnand %p3240_p3, %p3234_p0 }
  0x23   : > { %3244 = shalt.err (!%p3241_p4)
}
  0x24   : > { %s3314_s10 = smov 64   ;;  %s3315_s12 = smov 4  }
  0x25   : > { %2889 = dma.hbm_to_vmem [thread:$0]  (!%p3429_p10), %s259_s18, 1024, %s261_s20, %s250_s29, %s3314_s10, %s3314_s10, %s3315_s12  }
  0x26   : > { %p2563_p5 = scmp.ge.s32.totalorder %s3311_s28, 1  ;;  %p292_p6 = scmp.lt.s32.totalorder %s3311_s28, 5 }
  0x28   : > { %p293_p7 = pnand %p2563_p5, %p292_p6 }
  0x29   : > { %s298_s14 = sand.u32 (!%p293_p7), 1, %s3287_s22  }
  0x2a   : > { %296 = sbr.rel (%p293_p7) target bundleno = 2522 (0x9da), region = 44  ;;  %s2564_s16 = sshll.u32 (!%p293_p7), %s298_s14, 6 }
  0x2b   : > { %s299_s7 = scalar_lea.sflag (!%p293_p7), [#allocation3], %s298_s14  ;;  %s3440_s17 = scalar_lea.vmem (!%p293_p7), [#allocation2], %s2564_s16 }
  0x2f   : > { %3278 = dma.done.wait (%p3419_p9), %s299_s7, 1024  }
  0x30   : > { %3280 = vsyncadd (%p3419_p9), %s299_s7, 4294966272  ;;  %s2565_s18 = sshll.u32 %s3299_s25, 1  ;;  %p365_p8 = scmp.lt.s32.totalorder %s3295_s24, 1 }
  0x31   : > { %p359_p10 = scmp.lt.s32.totalorder %s2565_s18, 3  ;;  %s3970_s3 = sld [smem:[#allocation10_spill]] }
  0x32   : > { %s366_s19 = scalar_select %p365_p8, %s3295_s24, 1 }
  0x33   : > { %s3985_s18 = smov (!%p359_p10, %s2565_s18), 3  ;;  %p2578_p9 = scmp.ne.s32.totalorder %s3295_s24, 0 }
  0x34   : > { %s2883_s20 = smul.u32 192, %s366_s19  ;;  %s2663_s21 = sshll.u32 %s366_s19, 7 }
  0x35   : > { %s2662_s29 = sshll.u32 %s3985_s18, 4  ;;  %s3465_s30 = scalar_lea.vmem %s3954_s4, %s2663_s21 }
  0x36   : > { %s363_s13 = scalar_lea.vmem %s3950_s0, %s2662_s29  ;;  %s3460_s25 = scalar_lea.vmem %s3951_s1, %s2883_s20 }
  0x37   : > { %s3452_s15 = scalar_lea.vmem %s3970_s3, %s2663_s21  ;;  %s2665_s18 = sshll.u32 %s366_s19, 4 }
  0x38   : > { %s3470_s8 = scalar_lea.vmem %s3955_s5, %s2665_s18  ;;  %s3475_s10 = scalar_lea.vmem %s3956_s6, %s2662_s29 }
  0x39   : > { %396 = sbr.rel (%p2578_p9) target bundleno = 65 (0x41), region = 52 }
  0x3e   : > { %v397_v0 = vld [vmem:[%s363_s13] sm:$0xff]  ;;  %v398_v1 = vld [vmem:[%s363_s13 + $0x8] sm:$0xff]  ;;  %v399_v2 = vld [vmem:[%s363_s13 + $0x10] sm:$0xff] }
  0x3f   : > { %401 = vst [vmem:[%s3475_s10] sm:$0xff] %v397_v0  ;;  %402 = vst [vmem:[%s3475_s10 + $0x8] sm:$0xff] %v398_v1  ;;  %v400_v3 = vld [vmem:[%s363_s13 + $0x18] sm:$0xff] }
  0x40   : > { %403 = vst [vmem:[%s3475_s10 + $0x10] sm:$0xff] %v399_v2  ;;  %404 = vst [vmem:[%s3475_s10 + $0x18] sm:$0xff] %v400_v3 }
  0x41 PF: > { %v3053_v4 = vld [vmem:[%s3460_s25 + $0xac] ss:$12 sps:$4 sm:$0xff]   ;;  %v3055_v5 = vld [vmem:[%s3460_s25 + $0xa8] ss:$12 sps:$4 sm:$0xff]   ;;  %v3316_v6 = vmov 0   ;;  %v3317_v27 = vmov 0.0  }
  0x42   : > { %603 = vmatprep.mubr.bf16.mxu0 %v3316_v6  ;;  %571 = vmatprep.subr.bf16.mxu0 %v3053_v4  ;;  %v3056_v7 = vld [vmem:[%s3460_s25 + $0x94] ss:$12 sps:$4 sm:$0xff]   ;;  %v3058_v8 = vld [vmem:[%s3460_s25 + $0x90] ss:$12 sps:$4 sm:$0xff]   ;;  %v3061_v10 = vld [vmem:[%s3460_s25 + $0x78] ss:$12 sps:$4 sm:$0xff]  }
  0x43   : > { %572 = vmatpush1.bf16.msra.mxu0 %v3055_v5  ;;  %v3059_v9 = vld [vmem:[%s3460_s25 + $0x7c] ss:$12 sps:$4 sm:$0xff]   ;;  %v3062_v11 = vld [vmem:[%s3460_s25 + $0x64] ss:$12 sps:$4 sm:$0xff]   ;;  %v3064_v13 = vld [vmem:[%s3460_s25 + $0x60] ss:$12 sps:$4 sm:$0xff]  }
  0x44   : > { %573 = vmatprep.subr.bf16.mxu0 %v3056_v7  ;;  %v3065_v14 = vld [vmem:[%s3460_s25 + $0x4c] ss:$12 sps:$4 sm:$0xff]   ;;  %v3067_v17 = vld [vmem:[%s3460_s25 + $0x48] ss:$12 sps:$4 sm:$0xff]   ;;  %v3070_v19 = vld [vmem:[%s3460_s25 + $0x30] ss:$12 sps:$4 sm:$0xff]  }
  0x45   : > { %v3068_v18 = vld [vmem:[%s3460_s25 + $0x34] ss:$12 sps:$4 sm:$0xff]   ;;  %v3071_v20 = vld [vmem:[%s3460_s25 + $0x1c] ss:$12 sps:$4 sm:$0xff]   ;;  %v3073_v21 = vld [vmem:[%s3460_s25 + $0x18] ss:$12 sps:$4 sm:$0xff]  }
  0x46   : > { %v405_v12 = vld [vmem:[%s3475_s10] sm:$0xff]  ;;  %v406_v15 = vld [vmem:[%s3475_s10 + $0x8] sm:$0xff]  ;;  %vm3318_vm0 = vmmov 0   ;;  %v3077_v28 = vld [vmem:[%s3460_s25 + $0xb0] ss:$12 sps:$4 sm:$0xff]   ;;  %s3319_s2 = smov 96  }
  0x47   : > { %574 = vmatpush1.bf16.msra.mxu0 %v3058_v8  ;;  %v409_v16 = vpack.c.bf16 %v406_v15, %v405_v12  ;;  %v3074_v22 = vld [vmem:[%s3460_s25 + $0x4] ss:$12 sps:$4 sm:$0xff]   ;;  %v3076_v23 = vld [vmem:[%s3460_s25] ss:$12 sps:$4 sm:$0xff]   ;;  %v408_v25 = vld [vmem:[%s3475_s10 + $0x18] sm:$0xff]  ;;  %2747 = vmatprep.subr.bf16.mxu1 %v3077_v28  ;;  %vm833_vm1 = vcmask 261120  }
  0x48   : > { %575 = vmatprep.subr.bf16.mxu0 %v3059_v9  ;;  %v407_v24 = vld [vmem:[%s3475_s10 + $0x10] sm:$0xff]  ;;  %v3078_v29 = vld [vmem:[%s3460_s25 + $0x98] ss:$12 sps:$4 sm:$0xff]   ;;  %2748 = vmatpush3.bf16.msra.mxu1 %v3077_v28  ;;  %v3079_v30 = vld [vmem:[%s3460_s25 + $0x80] ss:$12 sps:$4 sm:$0xff]   ;;  %s3320_s3 = smov 64  }
  0x49   : > { %2763 = vmatprep.mubr.bf16.mxu1 %v409_v16  ;;  %v410_v26 = vpack.c.bf16 %v408_v25, %v407_v24  ;;  %2749 = vmatprep.subr.bf16.mxu1 %v3078_v29  ;;  %v3080_v31 = vld [vmem:[%s3460_s25 + $0x68] ss:$12 sps:$4 sm:$0xff]   ;;  %v3081_v32 = vld [vmem:[%s3460_s25 + $0x50] ss:$12 sps:$4 sm:$0xff]   ;;  %v3082_v33 = vld [vmem:[%s3460_s25 + $0x38] ss:$12 sps:$4 sm:$0xff]  }
  0x4a   : > { %v3083_v34 = vld [vmem:[%s3460_s25 + $0x20] ss:$12 sps:$4 sm:$0xff]   ;;  %v3084_v35 = vld [vmem:[%s3460_s25 + $0x8] ss:$12 sps:$4 sm:$0xff]   ;;  %s3321_s24 = smov 32   ;;  %vm1210_vm2 = vcmask 130048  }
  0x4b   : > { %576 = vmatpush1.bf16.msra.mxu0 %v3061_v10  ;;  %vm1799_vm3 = vcmask 523264   ;;  %vm1804_vm4 = vcmask 785408  }
  0x4c   : > { %577 = vmatprep.subr.bf16.mxu0 %v3062_v11  ;;  %2750 = vmatpush3.bf16.msra.mxu1 %v3078_v29 }
  0x4d   : > { %2751 = vmatprep.subr.bf16.mxu1 %v3079_v30 }
  0x4f   : > { %578 = vmatpush1.bf16.msra.mxu0 %v3064_v13 }
  0x50   : > { %579 = vmatprep.subr.bf16.mxu0 %v3065_v14  ;;  %2752 = vmatpush3.bf16.msra.mxu1 %v3079_v30 }
  0x51   : > { %2753 = vmatprep.subr.bf16.mxu1 %v3080_v31 }
  0x53   : > { %580 = vmatpush1.bf16.msra.mxu0 %v3067_v17 }
  0x54   : > { %581 = vmatprep.subr.bf16.mxu0 %v3068_v18  ;;  %2754 = vmatpush3.bf16.msra.mxu1 %v3080_v31 }
  0x55   : > { %2755 = vmatprep.subr.bf16.mxu1 %v3081_v32 }
  0x57   : > { %582 = vmatpush1.bf16.msra.mxu0 %v3070_v19 }
  0x58   : > { %583 = vmatprep.subr.bf16.mxu0 %v3071_v20  ;;  %2756 = vmatpush3.bf16.msra.mxu1 %v3081_v32 }
  0x59   : > { %2757 = vmatprep.subr.bf16.mxu1 %v3082_v33 }
  0x5b   : > { %584 = vmatpush1.bf16.msra.mxu0 %v3073_v21 }
  0x5c   : > { %585 = vmatprep.subr.bf16.mxu0 %v3074_v22  ;;  %2758 = vmatpush3.bf16.msra.mxu1 %v3082_v33 }
  0x5d   : > { %2759 = vmatprep.subr.bf16.mxu1 %v3083_v34 }
  0x5f   : > { %586 = vmatpush1.bf16.msra.mxu0 %v3076_v23 }
  0x60   : > { %2767 = vmatprep.subr.bf16.mxu0 %v3317_v27  ;;  %2760 = vmatpush3.bf16.msra.mxu1 %v3083_v34 }
  0x61   : > { %2761 = vmatprep.subr.bf16.mxu1 %v3084_v35 }
  0x62   : > { %604 = vmatmul.mubr.bf16.vlgmr.msra.gmra.mxu0 %v409_v16 }
  0x63   : > { %613 = vmatprep.mubr.bf16.mxu0 %v3316_v6 }
  0x64   : > { %2762 = vmatpush3.bf16.msra.mxu1 %v3084_v35 }
  0x65   : > { %2779 = vmatprep.subr.bf16.mxu1 %v3317_v27 }
  0x67   : > { %2764 = vmatmul.mubr.bf16.vlgmr.msra.gmra.mxu1 %v410_v26 }
  0x68   : > { %2781 = vmatprep.mubr.msk.bf16.mxu1 %vm3318_vm0, %v3317_v27 }
  0x6a   : > { %614 = vmatmul.mubr.bf16.gmra.mxu0 %v410_v26 }
  0x6b   : > { %2769 = vmatprep.mubr.msk.bf16.mxu0 %vm3318_vm0, %v3317_v27 }
 0x122   : > { %v605_v36 = vpop.f32.mrf.mxu0 }
 0x123   : > { %677 = vrot.lane.b32.xlu1 %v605_v36, %s3319_s2  ;;  %v793_v47 = vmul.f32 0.088388346, %v605_v36 }
 0x124   : > { %v607_v37 = vpop.f32.mrf.mxu0 }
 0x126   : > { %v609_v38 = vpop.f32.mrf.mxu0 }
 0x127   : > { %679 = vrot.lane.b32.xlu1 %v609_v38, %s3319_s2  ;;  %v794_v45 = vmul.f32 0.088388346, %v609_v38 }
 0x128   : > { %v611_v39 = vpop.f32.mrf.mxu0 }
 0x129   : > { %v2963_v40 = vpack.i.bf16 %v611_v39, %v607_v37  ;;  %v817_v41 = vpack.c.bf16 %v611_v39, %v607_v37  ;;  %v809_v49 = vpack.c.bf16 %v794_v45, %v793_v47 }
 0x12a   : > { %v615_v42 = vpop.f32.mrf.mxu0 }
 0x12b   : > { %2964 = vrot.lane.b32.xlu0 %v2963_v40, %s3319_s2  ;;  %v838_v43 = vsel %vm833_vm1, %v817_v41, 0  ;;  %v795_v54 = vmul.f32 0.088388346, %v615_v42 }
 0x12c   : > { %v617_v44 = vpop.f32.mrf.mxu0  ;;  %2768 = vmatpush3.bf16.xpose.msra.mxu0 %v838_v43 }
 0x12d   : > { %2773 = vmatprep.subr.bf16.mxu0 %v3317_v27 }
 0x12e   : > { %v619_v46 = vpop.f32.mrf.mxu0 }
 0x12f   : > { %681 = vrot.lane.b32.xlu0 %v615_v42, %s3319_s2  ;;  %683 = vrot.lane.b32.xlu1 %v619_v46, %s3319_s2  ;;  %v796_v53 = vmul.f32 0.088388346, %v619_v46 }
 0x130   : > { %v621_v48 = vpop.f32.mrf.mxu0 }
 0x131   : > { %v2968_v50 = vpack.i.bf16 %v621_v48, %v617_v44  ;;  %v818_v51 = vpack.c.bf16 %v621_v48, %v617_v44  ;;  %v810_v55 = vpack.c.bf16 %v796_v53, %v795_v54  ;;  %v2765_v54 = vpop.f32.mrf.mxu1 }
 0x133   : > { %2770 = vmatmul.mubr.msk.bf16.vlgmr.msra.gmra.mxu0 %vm833_vm1, %v809_v49  ;;  %691 = vrot.lane.b32.xlu1 %v609_v38, %s3320_s3  ;;  %v885_v52 = vsel %vm833_vm1, %v818_v51, 0 }
 0x134   : > { %2969 = vrot.lane.b32.xlu0 %v2968_v50, %s3319_s2  ;;  %2774 = vmatpush3.bf16.xpose.msra.mxu0 %v885_v52 }
 0x135   : > { %2775 = vmatprep.mubr.msk.bf16.mxu0 %vm3318_vm0, %v3317_v27  ;;  %2785 = vmatprep.subr.bf16.mxu0 %v3317_v27 }
 0x137   : > { %2979 = vrot.lane.b32.xlu1 %v2968_v50, %s3320_s3 }
 0x138   : > { %2974 = vrot.lane.b32.xlu0 %v2963_v40, %s3320_s3 }
 0x13b   : > { %695 = vrot.lane.b32.xlu1 %v619_v46, %s3320_s3  ;;  %2776 = vmatmul.mubr.msk.bf16.vlgmr.msra.gmra.mxu0 %vm833_vm1, %v810_v55  ;;  %v3576_v55 = vpop.f32.mrf.mxu1 }
 0x13c   : > { %689 = vrot.lane.b32.xlu0 %v605_v36, %s3320_s3  ;;  %2787 = vmatprep.mubr.msk.bf16.mxu0 %vm3318_vm0, %v3317_v27 }
 0x13f   : > { %2989 = vrot.lane.b32.xlu1 %v2968_v50, %s3321_s24 }
 0x140   : > { %693 = vrot.lane.b32.xlu0 %v615_v42, %s3320_s3 }
 0x143   : > { %703 = vrot.lane.b32.xlu1 %v609_v38, %s3321_s24 }
 0x144   : > { %2984 = vrot.lane.b32.xlu0 %v2963_v40, %s3321_s24 }
 0x147   : > { %707 = vrot.lane.b32.xlu1 %v619_v46, %s3321_s24 }
 0x148   : > { %701 = vrot.lane.b32.xlu0 %v605_v36, %s3321_s24 }
 0x14c   : > { %705 = vrot.lane.b32.xlu0 %v615_v42, %s3321_s24 }
 0x195   : > { %v678_v56 = vpop.permute.xlu1 %677 }
 0x196   : > { %v797_v3 = vmul.f32 0.088388346, %v678_v56  ;;  %v2766_v56 = vpop.f32.mrf.mxu1 }
 0x199   : > { %v680_v57 = vpop.permute.xlu1 %679 }
 0x19a   : > { %v798_v1 = vmul.f32 0.088388346, %v680_v57  ;;  %v826_v57 = vpack.c.bf16 %v2766_v56, %v2765_v54 }
 0x19c   : > { %v811_v8 = vpack.c.bf16 %v798_v1, %v797_v3 }
 0x19d   : > { %v2965_v58 = vpop.permute.xlu0 %2964 }
 0x19e   : > { %v2967_v59 = vunpack.i.h.bf16 %v2965_v58  ;;  %v2966_v60 = vunpack.i.l.bf16 %v2965_v58  ;;  %v3578_v58 = vpop.f32.mrf.mxu1 }
 0x1a0   : > { %v819_v61 = vpack.c.bf16 %v2967_v59, %v2966_v60  ;;  %v825_v59 = vpack.c.bf16 %v3578_v58, %v3576_v55  ;;  %v3583_v60 = vpack.i.bf16 %v2766_v56, %v2765_v54 }
 0x1a1   : > { %v682_v62 = vpop.permute.xlu0 %681  ;;  %v684_v63 = vpop.permute.xlu1 %683 }
 0x1a2   : > { %v932_v0 = vsel %vm833_vm1, %v819_v61, 0  ;;  %v799_v17 = vmul.f32 0.088388346, %v682_v62  ;;  %v800_v18 = vmul.f32 0.088388346, %v684_v63 }
 0x1a3   : > { %2780 = vmatpush3.bf16.xpose.msra.mxu1 %v932_v0 }
 0x1a4   : > { %2791 = vmatprep.subr.bf16.mxu1 %v3317_v27  ;;  %v812_v24 = vpack.c.bf16 %v800_v18, %v799_v17 }
 0x1a5   : > { %v692_v2 = vpop.permute.xlu1 %691 }
 0x1a6   : > { %v2970_v4 = vpop.permute.xlu0 %2969  ;;  %v802_v29 = vmul.f32 0.088388346, %v692_v2 }
 0x1a7   : > { %v2972_v5 = vunpack.i.h.bf16 %v2970_v4  ;;  %v2971_v7 = vunpack.i.l.bf16 %v2970_v4 }
 0x1a9   : > { %v820_v9 = vpack.c.bf16 %v2972_v5, %v2971_v7  ;;  %v2980_v10 = vpop.permute.xlu1 %2979 }
 0x1aa   : > { %v2982_v11 = vunpack.i.h.bf16 %v2980_v10  ;;  %v2975_v12 = vpop.permute.xlu0 %2974  ;;  %2782 = vmatmul.mubr.msk.bf16.vlgmr.msra.gmra.mxu1 %vm833_vm1, %v811_v8  ;;  %v2981_v13 = vunpack.i.l.bf16 %v2980_v10 }
 0x1ab   : > { %v2977_v14 = vunpack.i.h.bf16 %v2975_v12  ;;  %v2976_v15 = vunpack.i.l.bf16 %v2975_v12  ;;  %v979_v16 = vsel %vm833_vm1, %v820_v9, 0  ;;  %2793 = vmatprep.mubr.msk.bf16.mxu1 %vm3318_vm0, %v3317_v27 }
 0x1ac   : > { %2786 = vmatpush3.bf16.xpose.msra.mxu0 %v979_v16  ;;  %v822_v22 = vpack.c.bf16 %v2982_v11, %v2981_v13 }
 0x1ad   : > { %v821_v19 = vpack.c.bf16 %v2977_v14, %v2976_v15  ;;  %v696_v20 = vpop.permute.xlu1 %695  ;;  %2797 = vmatprep.subr.bf16.mxu0 %v3317_v27 }
 0x1ae   : > { %v690_v21 = vpop.permute.xlu0 %689  ;;  %v1073_v32 = vsel %vm833_vm1, %v822_v22, 0  ;;  %v804_v37 = vmul.f32 0.088388346, %v696_v20 }
 0x1af   : > { %v1026_v23 = vsel %vm833_vm1, %v821_v19, 0  ;;  %v801_v25 = vmul.f32 0.088388346, %v690_v21 }
 0x1b0   : > { %2792 = vmatpush3.bf16.xpose.msra.mxu1 %v1026_v23 }
 0x1b1   : > { %v2990_v26 = vpop.permute.xlu1 %2989  ;;  %2803 = vmatprep.subr.bf16.mxu1 %v3317_v27  ;;  %v813_v33 = vpack.c.bf16 %v802_v29, %v801_v25 }
 0x1b2   : > { %v694_v28 = vpop.permute.xlu0 %693  ;;  %v2992_v30 = vunpack.i.h.bf16 %v2990_v26  ;;  %v2991_v31 = vunpack.i.l.bf16 %v2990_v26 }
 0x1b3   : > { %2788 = vmatmul.mubr.msk.bf16.vlgmr.msra.gmra.mxu0 %vm833_vm1, %v812_v24  ;;  %v803_v34 = vmul.f32 0.088388346, %v694_v28 }
 0x1b4   : > { %2798 = vmatpush3.bf16.xpose.msra.mxu0 %v1073_v32  ;;  %2799 = vmatprep.mubr.msk.bf16.mxu0 %vm3318_vm0, %v3317_v27  ;;  %v824_v38 = vpack.c.bf16 %v2992_v30, %v2991_v31 }
 0x1b5   : > { %2809 = vmatprep.subr.bf16.mxu0 %v3317_v27  ;;  %v704_v35 = vpop.permute.xlu1 %703  ;;  %v814_v41 = vpack.c.bf16 %v804_v37, %v803_v34 }
 0x1b6   : > { %v2985_v36 = vpop.permute.xlu0 %2984  ;;  %v1167_v45 = vsel %vm833_vm1, %v824_v38, 0  ;;  %v806_v49 = vmul.f32 0.088388346, %v704_v35 }
 0x1b7   : > { %v2987_v39 = vunpack.i.h.bf16 %v2985_v36  ;;  %v2986_v40 = vunpack.i.l.bf16 %v2985_v36  ;;  %2794 = vmatmul.mubr.msk.bf16.vlgmr.msra.gmra.mxu1 %vm833_vm1, %v813_v33 }
 0x1b8   : > { %2805 = vmatprep.mubr.msk.bf16.mxu1 %vm3318_vm0, %v3317_v27 }
 0x1b9   : > { %v823_v42 = vpack.c.bf16 %v2987_v39, %v2986_v40  ;;  %v708_v46 = vpop.permute.xlu1 %707 }
 0x1ba   : > { %v702_v43 = vpop.permute.xlu0 %701  ;;  %v808_v50 = vmul.f32 0.088388346, %v708_v46 }
 0x1bb   : > { %2800 = vmatmul.mubr.msk.bf16.vlgmr.msra.gmra.mxu0 %vm833_vm1, %v814_v41  ;;  %v1120_v44 = vsel %vm833_vm1, %v823_v42, 0  ;;  %v805_v47 = vmul.f32 0.088388346, %v702_v43 }
 0x1bc   : > { %2804 = vmatpush3.bf16.xpose.msra.mxu1 %v1120_v44  ;;  %2810 = vmatpush3.bf16.xpose.msra.mxu0 %v1167_v45 }
 0x1bd   : > { %2811 = vmatprep.mubr.msk.bf16.mxu0 %vm3318_vm0, %v3317_v27  ;;  %2815 = vmatprep.subr.bf16.mxu1 %v3317_v27  ;;  %v815_v52 = vpack.c.bf16 %v806_v49, %v805_v47  ;;  %v3652_v47 = vpack.i.bf16 %v3578_v58, %v3576_v55 }
 0x1be   : > { %v706_v48 = vpop.permute.xlu0 %705  ;;  %2821 = vmatprep.subr.bf16.mxu0 %v3317_v27 }
 0x1bf   : > { %v807_v51 = vmul.f32 0.088388346, %v706_v48 }
 0x1c1   : > { %v816_v53 = vpack.c.bf16 %v808_v50, %v807_v51 }
 0x1c3   : > { %2806 = vmatmul.mubr.msk.bf16.vlgmr.msra.gmra.mxu1 %vm833_vm1, %v815_v52  ;;  %2812 = vmatmul.mubr.msk.bf16.vlgmr.msra.gmra.mxu0 %vm833_vm1, %v816_v53 }
 0x1c4   : > { %2817 = vmatprep.mubr.msk.bf16.mxu1 %vm3318_vm0, %v3317_v27  ;;  %2823 = vmatprep.mubr.msk.bf16.mxu0 %vm3318_vm0, %v3317_v27 }
 0x1c5   : > { %2822 = vmatpush3.bf16.msra.mxu0 %v826_v57  ;;  %2816 = vmatpush3.bf16.msra.mxu1 %v825_v59 }
 0x1c6   : > { %2833 = vmatprep.subr.bf16.mxu0 %v3317_v27  ;;  %2827 = vmatprep.subr.bf16.mxu1 %v3317_v27 }
 0x1f3   : > { %v3586_v61 = vpop.f32.mrf.mxu0 }
 0x1f4   : > { %v1211_v62 = vsel %vm1210_vm2, %v3586_v61, -inf }
 0x1f5   : > { %1212 = vmax.xlane.f32.xlu0 %v1211_v62  ;;  %v2771_v63 = vpop.f32.mrf.mxu0 }
 0x1f7   : > { %v3590_v0 = vpop.f32.mrf.mxu0 }
 0x1f8   : > { %v1214_v1 = vsel %vm1210_vm2, %v3590_v0, -inf }
 0x1f9   : > { %1215 = vmax.xlane.f32.xlu1 %v1214_v1  ;;  %v2772_v2 = vpop.f32.mrf.mxu0 }
 0x1fb   : > { %v3594_v3 = vpop.f32.mrf.mxu0 }
 0x1fc   : > { %v1217_v4 = vsel %vm1210_vm2, %v3594_v3, -inf }
 0x1fd   : > { %1218 = vmax.xlane.f32.xlu0 %v1217_v4  ;;  %v2777_v5 = vpop.f32.mrf.mxu0 }
 0x1ff   : > { %v3598_v7 = vpop.f32.mrf.mxu0 }
 0x200   : > { %v1220_v8 = vsel %vm1210_vm2, %v3598_v7, -inf }
 0x201   : > { %1221 = vmax.xlane.f32.xlu0 %v1220_v8  ;;  %v2778_v9 = vpop.f32.mrf.mxu0 }
 0x26a   : > { %v3602_v10 = vpop.f32.mrf.mxu1 }
 0x26b   : > { %v1223_v11 = vsel %vm1210_vm2, %v3602_v10, -inf }
 0x26c   : > { %v2783_v12 = vpop.f32.mrf.mxu1  ;;  %1224 = vmax.xlane.f32.xlu1 %v1223_v11 }
 0x26e   : > { %v3606_v13 = vpop.f32.mrf.mxu1 }
 0x26f   : > { %v1226_v14 = vsel %vm1210_vm2, %v3606_v13, -inf }
 0x270   : > { %v2784_v15 = vpop.f32.mrf.mxu1  ;;  %1227 = vmax.xlane.f32.xlu0 %v1226_v14 }
 0x273   : > { %v3610_v16 = vpop.f32.mrf.mxu0 }
 0x274   : > { %v1229_v17 = vsel %vm1210_vm2, %v3610_v16, -inf }
 0x275   : > { %1230 = vmax.xlane.f32.xlu1 %v1229_v17  ;;  %v2789_v18 = vpop.f32.mrf.mxu0 }
 0x277   : > { %v3614_v19 = vpop.f32.mrf.mxu0  ;;  %v3616_v20 = vpop.f32.mrf.mxu1 }
 0x278   : > { %v1235_v21 = vsel %vm1210_vm2, %v3616_v20, -inf  ;;  %v1232_v22 = vsel %vm1210_vm2, %v3614_v19, -inf }
 0x279   : > { %v2795_v23 = vpop.f32.mrf.mxu1  ;;  %1236 = vmax.xlane.f32.xlu1 %v1235_v21  ;;  %1233 = vmax.xlane.f32.xlu0 %v1232_v22  ;;  %v2790_v24 = vpop.f32.mrf.mxu0 }
 0x27b   : > { %v3622_v25 = vpop.f32.mrf.mxu1  ;;  %v3624_v26 = vpop.f32.mrf.mxu0 }
 0x27c   : > { %v1238_v28 = vsel %vm1210_vm2, %v3622_v25, -inf  ;;  %v1241_v29 = vsel %vm1210_vm2, %v3624_v26, -inf }
 0x27d   : > { %v2796_v30 = vpop.f32.mrf.mxu1  ;;  %1239 = vmax.xlane.f32.xlu0 %v1238_v28  ;;  %1242 = vmax.xlane.f32.xlu1 %v1241_v29  ;;  %v2801_v31 = vpop.f32.mrf.mxu0 }
 0x27e   : > { %v1213_v48 = vpop.xlane.xlu0 %1212 }
 0x27f   : > { %v3630_v32 = vpop.f32.mrf.mxu0  ;;  %v1259_v53 = vsub.f32 %v3586_v61, %v1213_v48 }
 0x280   : > { %v1244_v33 = vsel %vm1210_vm2, %v3630_v32, -inf }
 0x281   : > { %1245 = vmax.xlane.f32.xlu0 %v1244_v33  ;;  %v2802_v34 = vpop.f32.mrf.mxu0  ;;  %v1275_v56 = vmul.f32 1.442695, %v1259_v53 }
 0x282   : > { %v1216_v50 = vpop.xlane.xlu1 %1215 }
 0x283   : > { %v3634_v35 = vpop.f32.mrf.mxu1  ;;  %v3636_v36 = vpop.f32.mrf.mxu0  ;;  %v1260_v51 = vsub.f32 %v3590_v0, %v1216_v50 }
 0x284   : > { %v1247_v37 = vsel %vm1210_vm2, %v3634_v35, -inf  ;;  %v1253_v43 = vsel %vm1210_vm2, %v3636_v36, -inf }
 0x285   : > { %v2807_v38 = vpop.f32.mrf.mxu1  ;;  %1248 = vmax.xlane.f32.xlu1 %v1247_v37  ;;  %v2813_v39 = vpop.f32.mrf.mxu0  ;;  %v1277_v54 = vmul.f32 1.442695, %v1260_v51 }
 0x286   : > { %v1219_v49 = vpop.xlane.xlu0 %1218 }
 0x287   : > { %v3640_v40 = vpop.f32.mrf.mxu1  ;;  %v3642_v41 = vpop.f32.mrf.mxu0  ;;  %3133 = vpow2.f32 %v1277_v54  ;;  %v1261_v57 = vsub.f32 %v3594_v3, %v1219_v49 }
 0x288   : > { %v1250_v42 = vsel %vm1210_vm2, %v3640_v40, -inf  ;;  %v1256_v46 = vsel %vm1210_vm2, %v3642_v41, -inf  ;;  %3135 = vpow2.f32 %v1275_v56 }
 0x289   : > { %v2808_v44 = vpop.f32.mrf.mxu1  ;;  %1251 = vmax.xlane.f32.xlu0 %v1250_v42  ;;  %1254 = vmax.xlane.f32.xlu1 %v1253_v43  ;;  %v2814_v45 = vpop.f32.mrf.mxu0  ;;  %v1279_v59 = vmul.f32 1.442695, %v1261_v57 }
 0x28a   : > { %v1222_v52 = vpop.xlane.xlu0 %1221 }
 0x28b   : > { %v1262_v55 = vsub.f32 %v3598_v7, %v1222_v52 }
 0x28d   : > { %1257 = vmax.xlane.f32.xlu0 %v1256_v46  ;;  %v1281_v58 = vmul.f32 1.442695, %v1262_v55 }
 0x28f   : > { %3137 = vpow2.f32 %v1281_v58 }
 0x290   : > { %3139 = vpow2.f32 %v1279_v59 }
 0x294   : > { %v3666_v62 = vpop.eup %3133 }
 0x295   : > { %v3668_v63 = vpop.eup %3135  ;;  %v1310_v0 = vsel %vm1210_vm2, %v3666_v62, 0.0 }
 0x296   : > { %v1307_v1 = vsel %vm1210_vm2, %v3668_v63, 0.0 }
 0x29a   : > { %2994 = vrot.lane.b32.xlu1 %v3652_v47, %s3319_s2 }
 0x29c   : > { %v3672_v61 = vpop.eup %3137 }
 0x29d   : > { %v1316_v2 = vsel %vm1210_vm2, %v3672_v61, 0.0  ;;  %v3678_v3 = vpop.eup %3139 }
 0x29e   : > { %3004 = vrot.lane.b32.xlu1 %v3652_v47, %s3320_s3  ;;  %v1313_v4 = vsel %vm1210_vm2, %v3678_v3, 0.0 }
 0x2a2   : > { %3009 = vrot.lane.b32.xlu1 %v3583_v60, %s3320_s3 }
 0x2a3   : > { %2999 = vrot.lane.b32.xlu0 %v3583_v60, %s3319_s2 }
 0x2c2   : > { %1311 = vadd.xlane.f32.xlu0 %v1310_v0 }
 0x2c6   : > { %1308 = vadd.xlane.f32.xlu1 %v1307_v1  ;;  %1317 = vadd.xlane.f32.xlu0 %v1316_v2 }
 0x2ca   : > { %1314 = vadd.xlane.f32.xlu1 %v1313_v4 }
 0x2f5   : > { %v1225_v5 = vpop.xlane.xlu1 %1224 }
 0x2f6   : > { %v1263_v7 = vsub.f32 %v3602_v10, %v1225_v5 }
 0x2f8   : > { %v1283_v8 = vmul.f32 1.442695, %v1263_v7 }
 0x2f9   : > { %v1228_v9 = vpop.xlane.xlu0 %1227 }
 0x2fa   : > { %3141 = vpow2.f32 %v1283_v8  ;;  %v1264_v11 = vsub.f32 %v3606_v13, %v1228_v9 }
 0x2fc   : > { %v1285_v12 = vmul.f32 1.442695, %v1264_v11 }
 0x2fe   : > { %3143 = vpow2.f32 %v1285_v12  ;;  %v1231_v14 = vpop.xlane.xlu1 %1230 }
 0x2ff   : > { %v1265_v15 = vsub.f32 %v3610_v16, %v1231_v14 }
 0x301   : > { %v1287_v17 = vmul.f32 1.442695, %v1265_v15 }
 0x302   : > { %v1237_v18 = vpop.xlane.xlu1 %1236  ;;  %v1234_v21 = vpop.xlane.xlu0 %1233 }
 0x303   : > { %3145 = vpow2.f32 %v1287_v17  ;;  %v1267_v22 = vsub.f32 %v3616_v20, %v1237_v18  ;;  %v1266_v23 = vsub.f32 %v3614_v19, %v1234_v21 }
 0x305   : > { %v1291_v24 = vmul.f32 1.442695, %v1267_v22  ;;  %v1289_v10 = vmul.f32 1.442695, %v1266_v23 }
 0x306   : > { %v1240_v28 = vpop.xlane.xlu0 %1239  ;;  %v1243_v29 = vpop.xlane.xlu1 %1242 }
 0x307   : > { %v3687_v30 = vpop.eup %3141  ;;  %3147 = vpow2.f32 %v1291_v24  ;;  %v1268_v13 = vsub.f32 %v3622_v25, %v1240_v28  ;;  %v1269_v31 = vsub.f32 %v3624_v26, %v1243_v29 }
 0x308   : > { %3149 = vpow2.f32 %v1289_v10  ;;  %v1319_v16 = vsel %vm1210_vm2, %v3687_v30, 0.0 }
 0x309   : > { %v1293_v33 = vmul.f32 1.442695, %v1268_v13  ;;  %v1295_v34 = vmul.f32 1.442695, %v1269_v31  ;;  %1320 = vadd.xlane.f32.xlu1 %v1319_v16 }
 0x30a   : > { %v1246_v20 = vpop.xlane.xlu0 %1245 }
 0x30b   : > { %v3693_v19 = vpop.eup %3143  ;;  %3151 = vpow2.f32 %v1293_v33  ;;  %v1270_v37 = vsub.f32 %v3630_v32, %v1246_v20 }
 0x30c   : > { %3153 = vpow2.f32 %v1295_v34  ;;  %v1322_v38 = vsel %vm1210_vm2, %v3693_v19, 0.0 }
 0x30d   : > { %v1297_v25 = vmul.f32 1.442695, %v1270_v37  ;;  %1323 = vadd.xlane.f32.xlu0 %v1322_v38 }
 0x30e   : > { %v1249_v26 = vpop.xlane.xlu1 %1248 }
 0x30f   : > { %3155 = vpow2.f32 %v1297_v25  ;;  %v1271_v39 = vsub.f32 %v3634_v35, %v1249_v26 }
 0x310   : > { %v3699_v42 = vpop.eup %3145 }
 0x311   : > { %v1299_v43 = vmul.f32 1.442695, %v1271_v39  ;;  %v1325_v44 = vsel %vm1210_vm2, %v3699_v42, 0.0 }
 0x312   : > { %v1252_v45 = vpop.xlane.xlu0 %1251  ;;  %1326 = vadd.xlane.f32.xlu1 %v1325_v44  ;;  %v1255_v46 = vpop.xlane.xlu1 %1254 }
 0x313   : > { %3157 = vpow2.f32 %v1299_v43  ;;  %v1272_v32 = vsub.f32 %v3640_v40, %v1252_v45  ;;  %v1273_v48 = vsub.f32 %v3636_v36, %v1255_v46 }
 0x314   : > { %v3705_v49 = vpop.eup %3147 }
 0x315   : > { %v3707_v50 = vpop.eup %3149  ;;  %v1301_v51 = vmul.f32 1.442695, %v1272_v32  ;;  %v1303_v35 = vmul.f32 1.442695, %v1273_v48  ;;  %v1331_v52 = vsel %vm1210_vm2, %v3705_v49, 0.0 }
 0x316   : > { %1332 = vadd.xlane.f32.xlu1 %v1331_v52  ;;  %v1328_v53 = vsel %vm1210_vm2, %v3707_v50, 0.0  ;;  %v1258_v54 = vpop.xlane.xlu0 %1257  ;;  %v2995_v11 = vpop.permute.xlu1 %2994 }
 0x317   : > { %3159 = vpow2.f32 %v1301_v51  ;;  %1329 = vadd.xlane.f32.xlu0 %v1328_v53  ;;  %v1274_v40 = vsub.f32 %v3642_v41, %v1258_v54  ;;  %v2997_v10 = vunpack.i.h.bf16 %v2995_v11 }
 0x318   : > { %v3714_v55 = vpop.eup %3151  ;;  %3161 = vpow2.f32 %v1303_v35 }
 0x319   : > { %v3716_v36 = vpop.eup %3153  ;;  %v1305_v56 = vmul.f32 1.442695, %v1274_v40  ;;  %v1334_v57 = vsel %vm1210_vm2, %v3714_v55, 0.0 }
 0x31a   : > { %v1337_v58 = vsel %vm1210_vm2, %v3716_v36, 0.0  ;;  %v3005_v12 = vpop.permute.xlu1 %3004  ;;  %v3000_v14 = vpop.permute.xlu0 %2999 }
 0x31b   : > { %3163 = vpow2.f32 %v1305_v56  ;;  %1338 = vadd.xlane.f32.xlu1 %v1337_v58  ;;  %1335 = vadd.xlane.f32.xlu0 %v1334_v57  ;;  %v3002_v33 = vunpack.i.h.bf16 %v3000_v14  ;;  %v3001_v34 = vunpack.i.l.bf16 %v3000_v14  ;;  %v3007_v44 = vunpack.i.h.bf16 %v3005_v12 }
 0x31c   : > { %v3722_v59 = vpop.eup %3155  ;;  %v3006_v45 = vunpack.i.l.bf16 %v3005_v12 }
 0x31d   : > { %v1340_v41 = vsel %vm1210_vm2, %v3722_v59, 0.0 }
 0x31e   : > { %v3746_v15 = vpop.permute.xlu1 %3009  ;;  %v829_v52 = vpack.c.bf16 %v3007_v44, %v3006_v45 }
 0x31f   : > { %1341 = vadd.xlane.f32.xlu0 %v1340_v41 }
 0x320   : > { %v3726_v0 = vpop.eup %3157 }
 0x321   : > { %v1343_v1 = vsel %vm1210_vm2, %v3726_v0, 0.0 }
 0x322   : > { %1344 = vadd.xlane.f32.xlu1 %v1343_v1 }
 0x324   : > { %v3730_v2 = vpop.eup %3159 }
 0x325   : > { %v3732_v4 = vpop.eup %3161  ;;  %v1346_v5 = vsel %vm1210_vm2, %v3730_v2, 0.0 }
 0x326   : > { %v1349_v7 = vsel %vm1210_vm2, %v3732_v4, 0.0  ;;  %1347 = vadd.xlane.f32.xlu0 %v1346_v5 }
 0x327   : > { %1350 = vadd.xlane.f32.xlu1 %v1349_v7 }
 0x328   : > { %v3738_v8 = vpop.eup %3163 }
 0x329   : > { %v1352_v9 = vsel %vm1210_vm2, %v3738_v8, 0.0 }
 0x32a   : > { %1353 = vadd.xlane.f32.xlu0 %v1352_v9 }
 0x338   : > { %3019 = vrot.lane.b32.xlu1 %v3583_v60, %s3321_s24  ;;  %v2996_v60 = vunpack.i.l.bf16 %v2995_v11 }
 0x33a   : > { %v827_v16 = vpack.c.bf16 %v2997_v10, %v2996_v60 }
 0x340   : > { %3014 = vrot.lane.b32.xlu0 %v3652_v47, %s3321_s24 }
 0x34b   : > { %v1312_v17 = vpop.xlane.xlu0 %1311 }
 0x34c   : > { %3165 = vrcp.f32 %v1312_v17 }
 0x34f   : > { %v1309_v18 = vpop.xlane.xlu1 %1308  ;;  %v1318_v21 = vpop.xlane.xlu0 %1317 }
 0x350   : > { %3167 = vrcp.f32 %v1309_v18 }
 0x351   : > { %3169 = vrcp.f32 %v1318_v21 }
 0x353   : > { %v1315_v22 = vpop.xlane.xlu1 %1314 }
 0x354   : > { %3171 = vrcp.f32 %v1315_v22 }
 0x359   : > { %v3166_v23 = vpop.eup %3165 }
 0x35a   : > { %v1372_v47 = vmul.f32 %v3166_v23, %v3666_v62  ;;  %v828_v62 = vpack.c.bf16 %v3002_v33, %v3001_v34 }
 0x35d   : > { %v3168_v24 = vpop.eup %3167 }
 0x35e   : > { %v1371_v28 = vmul.f32 %v3168_v24, %v3668_v63  ;;  %v3170_v29 = vpop.eup %3169 }
 0x35f   : > { %v1374_v37 = vmul.f32 %v3170_v29, %v3672_v61 }
 0x360   : > { %v1387_v13 = vpack.c.bf16 %v1372_v47, %v1371_v28 }
 0x361   : > { %v3172_v31 = vpop.eup %3171 }
 0x362   : > { %2818 = vmatmul.mubr.msk.bf16.vlgmr.msra.gmra.mxu1 %vm1210_vm2, %v1387_v13  ;;  %v1373_v20 = vmul.f32 %v3172_v31, %v3678_v3 }
 0x363   : > { %2828 = vmatpush3.bf16.msra.mxu1 %v827_v16  ;;  %2829 = vmatprep.mubr.msk.bf16.mxu1 %vm3318_vm0, %v3317_v27 }
 0x364   : > { %v1388_v38 = vpack.c.bf16 %v1374_v37, %v1373_v20  ;;  %2839 = vmatprep.subr.bf16.mxu1 %v3317_v27 }
 0x366   : > { %2824 = vmatmul.mubr.msk.bf16.vlgmr.msra.gmra.mxu0 %vm1210_vm2, %v1388_v38 }
 0x367   : > { %2834 = vmatpush3.bf16.msra.mxu0 %v828_v62  ;;  %2835 = vmatprep.mubr.msk.bf16.mxu0 %vm3318_vm0, %v3317_v27 }
 0x368   : > { %2845 = vmatprep.subr.bf16.mxu0 %v3317_v27 }
 0x392   : > { %v1321_v63 = vpop.xlane.xlu1 %1320 }
 0x393   : > { %3173 = vrcp.f32 %v1321_v63 }
 0x396   : > { %v1324_v3 = vpop.xlane.xlu0 %1323 }
 0x397   : > { %3175 = vrcp.f32 %v1324_v3 }
 0x39b   : > { %v1327_v61 = vpop.xlane.xlu1 %1326 }
 0x39c   : > { %3177 = vrcp.f32 %v1327_v61  ;;  %v3086_v61 = vld [vmem:[%s3440_s17 + $0x30] sm:$0xff]  }
 0x39f   : > { %v1333_v25 = vpop.xlane.xlu1 %1332 }
 0x3a0   : > { %v1330_v26 = vpop.xlane.xlu0 %1329  ;;  %v3174_v39 = vpop.eup %3173 }
 0x3a1   : > { %3179 = vrcp.f32 %v1330_v26  ;;  %v1375_v48 = vmul.f32 %v3174_v39, %v3687_v30  ;;  %v3012_v30 = vunpack.i.h.bf16 %v3746_v15 }
 0x3a2   : > { %3181 = vrcp.f32 %v1333_v25 }
 0x3a4   : > { %v3176_v43 = vpop.eup %3175  ;;  %v1339_v46 = vpop.xlane.xlu1 %1338 }
 0x3a5   : > { %v1336_v32 = vpop.xlane.xlu0 %1335  ;;  %v1376_v51 = vmul.f32 %v3176_v43, %v3693_v19  ;;  %v3011_v19 = vunpack.i.l.bf16 %v3746_v15  ;;  %v3087_v43 = vld [vmem:[%s3440_s17 + $0x28] sm:$0xff]  }
 0x3a6   : > { %3183 = vrcp.f32 %v1336_v32 }
 0x3a7   : > { %3185 = vrcp.f32 %v1339_v46  ;;  %v1389_v35 = vpack.c.bf16 %v1376_v51, %v1375_v48  ;;  %v830_v9 = vpack.c.bf16 %v3012_v30, %v3011_v19  ;;  %v3088_v46 = vld [vmem:[%s3440_s17 + $0x20] sm:$0xff]   ;;  %v3089_v51 = vld [vmem:[%s3440_s17 + $0x18] sm:$0xff]  }
 0x3a9   : > { %v1342_v53 = vpop.xlane.xlu0 %1341  ;;  %2830 = vmatmul.mubr.msk.bf16.vlgmr.msra.gmra.mxu1 %vm1210_vm2, %v1389_v35  ;;  %v3178_v40 = vpop.eup %3177 }
 0x3aa   : > { %3187 = vrcp.f32 %v1342_v53  ;;  %2840 = vmatpush3.bf16.msra.mxu1 %v829_v52  ;;  %2841 = vmatprep.mubr.msk.bf16.mxu1 %vm3318_vm0, %v3317_v27  ;;  %v1377_v58 = vmul.f32 %v3178_v40, %v3699_v42  ;;  %v3090_v52 = vld [vmem:[%s3440_s17 + $0x10] sm:$0xff]  }
 0x3ab   : > { %v1345_v54 = vpop.xlane.xlu1 %1344  ;;  %2851 = vmatprep.subr.bf16.mxu1 %v3317_v27 }
 0x3ac   : > { %3189 = vrcp.f32 %v1345_v54 }
 0x3ae   : > { %v3180_v56 = vpop.eup %3179 }
 0x3af   : > { %v1348_v57 = vpop.xlane.xlu0 %1347  ;;  %v1378_v41 = vmul.f32 %v3180_v56, %v3707_v50  ;;  %v3182_v5 = vpop.eup %3181 }
 0x3b0   : > { %v1351_v1 = vpop.xlane.xlu1 %1350  ;;  %3191 = vrcp.f32 %v1348_v57  ;;  %v1379_v15 = vmul.f32 %v3182_v5, %v3705_v49  ;;  %v3091_v57 = vld [vmem:[%s3440_s17 + $0x8] sm:$0xff]  }
 0x3b1   : > { %v1390_v7 = vpack.c.bf16 %v1378_v41, %v1377_v58  ;;  %3193 = vrcp.f32 %v1351_v1 }
 0x3b3   : > { %v3184_v11 = vpop.eup %3183  ;;  %2836 = vmatmul.mubr.msk.bf16.vlgmr.msra.gmra.mxu0 %vm1210_vm2, %v1390_v7  ;;  %v1354_v12 = vpop.xlane.xlu0 %1353 }
 0x3b4   : > { %v3186_v14 = vpop.eup %3185  ;;  %2846 = vmatpush3.bf16.msra.mxu0 %v830_v9  ;;  %v3020_v17 = vpop.permute.xlu1 %3019  ;;  %3195 = vrcp.f32 %v1354_v12  ;;  %v1380_v42 = vmul.f32 %v3184_v11, %v3714_v55  ;;  %2847 = vmatprep.mubr.msk.bf16.mxu0 %vm3318_vm0, %v3317_v27  ;;  %v3092_v11 = vld [vmem:[%s3440_s17] sm:$0xff]  }
 0x3b5   : > { %2857 = vmatprep.subr.bf16.mxu0 %v3317_v27  ;;  %v3022_v18 = vunpack.i.h.bf16 %v3020_v17  ;;  %v3021_v21 = vunpack.i.l.bf16 %v3020_v17  ;;  %v1381_v24 = vmul.f32 %v3186_v14, %v3716_v36 }
 0x3b6   : > { %v1391_v22 = vpack.c.bf16 %v1380_v42, %v1379_v15 }
 0x3b7   : > { %v3188_v50 = vpop.eup %3187  ;;  %v3015_v23 = vpop.permute.xlu0 %3014  ;;  %v832_v55 = vpack.c.bf16 %v3022_v18, %v3021_v21 }
 0x3b8   : > { %v1382_v10 = vmul.f32 %v3188_v50, %v3722_v59  ;;  %2842 = vmatmul.mubr.msk.bf16.vlgmr.msra.gmra.mxu1 %vm1210_vm2, %v1391_v22  ;;  %v3017_v60 = vunpack.i.h.bf16 %v3015_v23  ;;  %v3016_v49 = vunpack.i.l.bf16 %v3015_v23 }
 0x3b9   : > { %2853 = vmatprep.mubr.msk.bf16.mxu1 %vm3318_vm0, %v3317_v27  ;;  %v3190_v29 = vpop.eup %3189 }
 0x3ba   : > { %v1392_v28 = vpack.c.bf16 %v1382_v10, %v1381_v24  ;;  %v831_v47 = vpack.c.bf16 %v3017_v60, %v3016_v49  ;;  %v1383_v36 = vmul.f32 %v3190_v29, %v3726_v0 }
 0x3bc   : > { %2848 = vmatmul.mubr.msk.bf16.vlgmr.msra.gmra.mxu0 %vm1210_vm2, %v1392_v28  ;;  %2852 = vmatpush3.bf16.msra.mxu1 %v831_v47 }
 0x3bd   : > { %2858 = vmatpush3.bf16.msra.mxu0 %v832_v55  ;;  %v3192_v13 = vpop.eup %3191  ;;  %2859 = vmatprep.mubr.msk.bf16.mxu0 %vm3318_vm0, %v3317_v27 }
 0x3be   : > { %v1384_v59 = vmul.f32 %v3192_v13, %v3730_v2  ;;  %v3194_v31 = vpop.eup %3193 }
 0x3bf   : > { %v1385_v34 = vmul.f32 %v3194_v31, %v3732_v4 }
 0x3c0   : > { %v1393_v16 = vpack.c.bf16 %v1384_v59, %v1383_v36 }
 0x3c1   : > { %v3196_v33 = vpop.eup %3195 }
 0x3c2   : > { %2854 = vmatmul.mubr.msk.bf16.vlgmr.msra.gmra.mxu1 %vm1210_vm2, %v1393_v16  ;;  %v1386_v20 = vmul.f32 %v3196_v33, %v3738_v8  ;;  %v3085_v8 = vld [vmem:[%s3440_s17 + $0x38] sm:$0xff]  }
 0x3c3   : > { %2863 = vmatprep.subr.bf16.mxu1 %v3085_v8 }
 0x3c4   : > { %v1394_v37 = vpack.c.bf16 %v1386_v20, %v1385_v34  ;;  %2864 = vmatpush3.bf16.msra.mxu1 %v3085_v8 }
 0x3c5   : > { %2865 = vmatprep.subr.bf16.mxu1 %v3086_v61 }
 0x3c6   : > { %2860 = vmatmul.mubr.msk.bf16.vlgmr.msra.gmra.mxu0 %vm1210_vm2, %v1394_v37 }
 0x3c7   : > { %2133 = vmatprep.mubr.bf16.mxu0 %v3316_v6 }
 0x3c8   : > { %2866 = vmatpush3.bf16.msra.mxu1 %v3086_v61 }
 0x3c9   : > { %2867 = vmatprep.subr.bf16.mxu1 %v3087_v43 }
 0x3cc   : > { %2868 = vmatpush3.bf16.msra.mxu1 %v3087_v43 }
 0x3cd   : > { %2869 = vmatprep.subr.bf16.mxu1 %v3088_v46 }
 0x3d0   : > { %2870 = vmatpush3.bf16.msra.mxu1 %v3088_v46 }
 0x3d1   : > { %2871 = vmatprep.subr.bf16.mxu1 %v3089_v51 }
 0x3d4   : > { %2872 = vmatpush3.bf16.msra.mxu1 %v3089_v51 }
 0x3d5   : > { %2873 = vmatprep.subr.bf16.mxu1 %v3090_v52 }
 0x3d8   : > { %2874 = vmatpush3.bf16.msra.mxu1 %v3090_v52 }
 0x3d9   : > { %2875 = vmatprep.subr.bf16.mxu1 %v3091_v57 }
 0x3dc   : > { %2876 = vmatpush3.bf16.msra.mxu1 %v3091_v57 }
 0x3dd   : > { %2877 = vmatprep.subr.bf16.mxu1 %v3092_v11 }
 0x3e0   : > { %2878 = vmatpush3.bf16.msra.mxu1 %v3092_v11 }
 0x422   : > { %v3791_v27 = vpop.f32.mrf.mxu1 }
 0x424   : > { %v2819_v0 = vpop.f32.mrf.mxu1 }
 0x426   : > { %v3793_v2 = vpop.f32.mrf.mxu1  ;;  %v3795_v38 = vpop.f32.mrf.mxu0 }
 0x428   : > { %v2820_v62 = vpop.f32.mrf.mxu1  ;;  %v2825_v63 = vpop.f32.mrf.mxu0 }
 0x42a   : > { %v3797_v3 = vpop.f32.mrf.mxu0 }
 0x42c   : > { %v2826_v4 = vpop.f32.mrf.mxu0 }
 0x469   : > { %v1520_v25 = vpop.f32.mrf.mxu1 }
 0x46b   : > { %v2831_v26 = vpop.f32.mrf.mxu1 }
 0x46d   : > { %v1523_v39 = vpop.f32.mrf.mxu1 }
 0x46e   : > { %v3023_v44 = vpack.i.bf16 %v1523_v39, %v1520_v25 }
 0x46f   : > { %v2832_v45 = vpop.f32.mrf.mxu1 }
 0x470   : > { %3024 = vrot.lane.b32.xlu0 %v3023_v44, %s3321_s24 }
 0x473   : > { %v1564_v32 = vpop.f32.mrf.mxu0 }
 0x475   : > { %v2837_v48 = vpop.f32.mrf.mxu0 }
 0x476   : > { %v3833_v48 = vld [vmem:[%s3470_s8] sm:$0xff] }
 0x477   : > { %v1567_v35 = vpop.f32.mrf.mxu0 }
 0x478   : > { %v3028_v53 = vpack.i.bf16 %v1567_v35, %v1564_v32  ;;  %v1608_v54 = vpop.f32.mrf.mxu1  ;;  %v1829_v32 = vlaneseq }
 0x479   : > { %v2838_v40 = vpop.f32.mrf.mxu0 }
 0x47a   : > { %v2843_v56 = vpop.f32.mrf.mxu1  ;;  %3029 = vrot.lane.b32.xlu1 %v3028_v53, %s3321_s24 }
 0x47b   : > { %v3837_v56 = vld [vmem:[%s3475_s10] sm:$0xff] }
 0x47c   : > { %v1652_v30 = vpop.f32.mrf.mxu0  ;;  %v1611_v19 = vpop.f32.mrf.mxu1 }
 0x47d   : > { %v3033_v58 = vpack.i.bf16 %v1611_v19, %v1608_v54 }
 0x47e   : > { %v2849_v41 = vpop.f32.mrf.mxu0  ;;  %v2844_v1 = vpop.f32.mrf.mxu1 }
 0x47f   : > { %3034 = vrot.lane.b32.xlu0 %v3033_v58, %s3320_s3  ;;  %v3841_v41 = vld [vmem:[%s3475_s10 + $0x8] sm:$0xff] }
 0x480   : > { %v1655_v5 = vpop.f32.mrf.mxu0 }
 0x481   : > { %v3038_v7 = vpack.i.bf16 %v1655_v5, %v1652_v30  ;;  %v3845_v5 = vld [vmem:[%s3475_s10 + $0x10] sm:$0xff] }
 0x482   : > { %v2850_v9 = vpop.f32.mrf.mxu0  ;;  %v1696_v12 = vpop.f32.mrf.mxu1 }
 0x483   : > { %3039 = vrot.lane.b32.xlu1 %v3038_v7, %s3320_s3  ;;  %v3849_v9 = vld [vmem:[%s3475_s10 + $0x18] sm:$0xff] }
 0x484   : > { %v2855_v14 = vpop.f32.mrf.mxu1 }
 0x485   : > { %v3095_v14 = vld [vmem:[%s3452_s15 + $0x74] ss:$8 sps:$4 sm:$0xff]  }
 0x486   : > { %v1699_v17 = vpop.f32.mrf.mxu1  ;;  %v1740_v15 = vpop.f32.mrf.mxu0  ;;  %2101 = vmatprep.subr.bf16.mxu0 %v3095_v14 }
 0x487   : > { %v3043_v42 = vpack.i.bf16 %v1699_v17, %v1696_v12  ;;  %v3093_v12 = vld [vmem:[%s3452_s15 + $0x70] ss:$8 sps:$4 sm:$0xff]  }
 0x488   : > { %v2856_v50 = vpop.f32.mrf.mxu1  ;;  %v2861_v18 = vpop.f32.mrf.mxu0  ;;  %2102 = vmatpush1.bf16.msra.mxu0 %v3093_v12 }
 0x489   : > { %3044 = vrot.lane.b32.xlu0 %v3043_v42, %s3319_s2 }
 0x48a   : > { %v1743_v21 = vpop.f32.mrf.mxu0 }
 0x48b   : > { %v3048_v22 = vpack.i.bf16 %v1743_v21, %v1740_v15 }
 0x48c   : > { %v2862_v23 = vpop.f32.mrf.mxu0 }
 0x48d   : > { %3049 = vrot.lane.b32.xlu1 %v3048_v22, %s3319_s2 }
 0x4e2   : > { %v3025_v24 = vpop.permute.xlu0 %3024 }
 0x4e3   : > { %v3027_v49 = vunpack.i.h.bf16 %v3025_v24  ;;  %v3026_v28 = vunpack.i.l.bf16 %v3025_v24 }
 0x4e5   : > { %v1796_v13 = vsel %vm833_vm1, %v3793_v2, %v3027_v49  ;;  %v1795_v36 = vsel %vm833_vm1, %v3791_v27, %v3026_v28 }
 0x4ec   : > { %v3030_v10 = vpop.permute.xlu1 %3029 }
 0x4ed   : > { %v3032_v31 = vunpack.i.h.bf16 %v3030_v10  ;;  %v3031_v16 = vunpack.i.l.bf16 %v3030_v10 }
 0x4ef   : > { %v1798_v27 = vsel %vm833_vm1, %v3797_v3, %v3032_v31  ;;  %v1797_v61 = vsel %vm833_vm1, %v3795_v38, %v3031_v16  ;;  %v3829_v3 = vshrl.u32 %v1829_v32, 7  ;;  %v3099_v31 = vld [vmem:[%s3452_s15 + $0x50] ss:$8 sps:$4 sm:$0xff]   ;;  %v3104_v16 = vld [vmem:[%s3452_s15 + $0x44] ss:$8 sps:$4 sm:$0xff]  }
 0x4f1   : > { %v3035_v60 = vpop.permute.xlu0 %3034  ;;  %v1831_v38 = vsub.s32 0, %v3829_v3  ;;  %v1989_v14 = vsub.s32 2, %v3829_v3 }
 0x4f2   : > { %v3037_v55 = vunpack.i.h.bf16 %v3035_v60  ;;  %v3036_v47 = vunpack.i.l.bf16 %v3035_v60 }
 0x4f3   : > { %v1832_v35 = vrot.slane %v3833_v48, %v1831_v38 }
 0x4f4   : > { %v1800_v20 = vsel %vm1799_vm3, %v1795_v36, %v3036_v47  ;;  %v1801_v37 = vsel %vm1799_vm3, %v1796_v13, %v3037_v55  ;;  %v3098_v13 = vld [vmem:[%s3452_s15 + $0x64] ss:$8 sps:$4 sm:$0xff]   ;;  %v3096_v36 = vld [vmem:[%s3452_s15 + $0x60] ss:$8 sps:$4 sm:$0xff]  }
 0x4f5   : > { %v3040_v29 = vpop.permute.xlu1 %3039  ;;  %2103 = vmatprep.subr.bf16.mxu0 %v3098_v13 }
 0x4f6   : > { %v3042_v0 = vunpack.i.h.bf16 %v3040_v29  ;;  %v3041_v62 = vunpack.i.l.bf16 %v3040_v29  ;;  %2104 = vmatpush1.bf16.msra.mxu0 %v3096_v36 }
 0x4f8   : > { %v1803_v39 = vsel %vm1799_vm3, %v1798_v27, %v3042_v0  ;;  %v1802_v43 = vsel %vm1799_vm3, %v1797_v61, %v3041_v62  ;;  %v3108_v0 = vld [vmem:[%s3452_s15 + $0x20] ss:$8 sps:$4 sm:$0xff]   ;;  %v3113_v62 = vld [vmem:[%s3452_s15 + $0x14] ss:$8 sps:$4 sm:$0xff]  }
 0x4f9   : > { %v3118_v27 = vld [vmem:[%s3465_s30 + $0x38] sm:$0xff]   ;;  %v3119_v61 = vld [vmem:[%s3465_s30 + $0x70] sm:$0xff]  }
 0x4fb   : > { %v3045_v59 = vpop.permute.xlu0 %3044 }
 0x4fc   : > { %v3047_v33 = vunpack.i.h.bf16 %v3045_v59  ;;  %v3046_v34 = vunpack.i.l.bf16 %v3045_v59  ;;  %v3101_v59 = vld [vmem:[%s3452_s15 + $0x54] ss:$8 sps:$4 sm:$0xff]  }
 0x4fd   : > { %2105 = vmatprep.subr.bf16.mxu0 %v3101_v59 }
 0x4fe   : > { %v1805_v63 = vsel %vm1804_vm4, %v1800_v20, %v3046_v34  ;;  %v1806_v4 = vsel %vm1804_vm4, %v1801_v37, %v3047_v33  ;;  %2106 = vmatpush1.bf16.msra.mxu0 %v3099_v31  ;;  %v3102_v33 = vld [vmem:[%s3452_s15 + $0x40] ss:$8 sps:$4 sm:$0xff]   ;;  %v3107_v34 = vld [vmem:[%s3452_s15 + $0x34] ss:$8 sps:$4 sm:$0xff]   ;;  %v3105_v20 = vld [vmem:[%s3452_s15 + $0x30] ss:$8 sps:$4 sm:$0xff]  }
 0x4ff   : > { %v3050_v2 = vpop.permute.xlu1 %3049  ;;  %v1809_v8 = vpack.c.bf16 %v1806_v4, %v1805_v63  ;;  %2107 = vmatprep.subr.bf16.mxu0 %v3104_v16  ;;  %v3110_v37 = vld [vmem:[%s3452_s15 + $0x24] ss:$8 sps:$4 sm:$0xff]   ;;  %v3111_v63 = vld [vmem:[%s3452_s15 + $0x10] ss:$8 sps:$4 sm:$0xff]  }
 0x500   : > { %v3052_v25 = vunpack.i.h.bf16 %v3050_v2  ;;  %v3051_v26 = vunpack.i.l.bf16 %v3050_v2  ;;  %v3116_v4 = vld [vmem:[%s3452_s15 + $0x4] ss:$8 sps:$4 sm:$0xff]   ;;  %v3114_v2 = vld [vmem:[%s3452_s15] ss:$8 sps:$4 sm:$0xff]   ;;  %v3128_v31 = vld [vmem:[%s3465_s30 + $0x10] sm:$0xff]  }
 0x501   : > { %2879 = vmatprep.mubr.bf16.mxu1 %v1809_v8  ;;  %v3117_v8 = vld [vmem:[%s3465_s30 + $0x78] sm:$0xff]   ;;  %v3129_v16 = vld [vmem:[%s3465_s30 + $0x48] sm:$0xff]  }
 0x502   : > { %v1808_v44 = vsel %vm1804_vm4, %v1803_v39, %v3052_v25  ;;  %v1807_v45 = vsel %vm1804_vm4, %v1802_v43, %v3051_v26  ;;  %2108 = vmatpush1.bf16.msra.mxu0 %v3102_v33  ;;  %2719 = vmatprep.subr.bf16.mxu1 %v3117_v8  ;;  %v3120_v25 = vld [vmem:[%s3465_s30 + $0x30] sm:$0xff]   ;;  %v3121_v26 = vld [vmem:[%s3465_s30 + $0x68] sm:$0xff]   ;;  %v3123_v43 = vld [vmem:[%s3465_s30 + $0x60] sm:$0xff]  }
 0x503   : > { %v1810_v46 = vpack.c.bf16 %v1808_v44, %v1807_v45  ;;  %2109 = vmatprep.subr.bf16.mxu0 %v3107_v34  ;;  %v3122_v39 = vld [vmem:[%s3465_s30 + $0x28] sm:$0xff]   ;;  %v3124_v44 = vld [vmem:[%s3465_s30 + $0x20] sm:$0xff]   ;;  %v3125_v45 = vld [vmem:[%s3465_s30 + $0x58] sm:$0xff]  }
 0x504   : > { %v3130_v33 = vld [vmem:[%s3465_s30 + $0x8] sm:$0xff]   ;;  %v3132_v34 = vld [vmem:[%s3465_s30] sm:$0xff]  }
 0x505   : > { %2880 = vmatmul.mubr.bf16.vlgmr.msra.gmra.mxu1 %v1810_v46  ;;  %v3126_v46 = vld [vmem:[%s3465_s30 + $0x18] sm:$0xff]  }
 0x506   : > { %2110 = vmatpush1.bf16.msra.mxu0 %v3105_v20  ;;  %2720 = vmatpush3.bf16.msra.mxu1 %v3118_v27  ;;  %v2015_v20 = vsub.s32 3, %v3829_v3 }
 0x507   : > { %2111 = vmatprep.subr.bf16.mxu0 %v3110_v37  ;;  %2721 = vmatprep.subr.bf16.mxu1 %v3119_v61 }
 0x50a   : > { %2112 = vmatpush1.bf16.msra.mxu0 %v3108_v0  ;;  %2722 = vmatpush3.bf16.msra.mxu1 %v3120_v25 }
 0x50b   : > { %2113 = vmatprep.subr.bf16.mxu0 %v3113_v62  ;;  %2723 = vmatprep.subr.bf16.mxu1 %v3121_v26  ;;  %v2016_v62 = vrot.slane %v3833_v48, %v2015_v20 }
 0x50e   : > { %2114 = vmatpush1.bf16.msra.mxu0 %v3111_v63  ;;  %2724 = vmatpush3.bf16.msra.mxu1 %v3122_v39 }
 0x50f   : > { %2115 = vmatprep.subr.bf16.mxu0 %v3116_v4  ;;  %2725 = vmatprep.subr.bf16.mxu1 %v3123_v43 }
 0x512   : > { %2116 = vmatpush1.bf16.msra.mxu0 %v3114_v2  ;;  %2726 = vmatpush3.bf16.msra.mxu1 %v3124_v44 }
 0x513   : > { %2727 = vmatprep.subr.bf16.mxu1 %v3125_v45 }
 0x516   : > { %2728 = vmatpush3.bf16.msra.mxu1 %v3126_v46 }
 0x5c5   : > { %v2881_v51 = vpop.f32.mrf.mxu1 }
 0x5c6   : > { %v1924_v40 = vadd.f32 %v2881_v51, %v1832_v35 }
 0x5c7   : > { %v1915_v52 = vpop.f32.mrf.mxu1 }
 0x5c8   : > { %v1916_v53 = vadd.f32 %v1915_v52, %v1832_v35  ;;  %v1932_v7 = vadd.f32 %v3845_v5, %v1924_v40 }
 0x5c9   : > { %v2882_v54 = vpop.f32.mrf.mxu1 }
 0x5ca   : > { %v1930_v30 = vadd.f32 %v3837_v56, %v1916_v53  ;;  %v1927_v58 = vadd.f32 %v2882_v54, %v1832_v35 }
 0x5cb   : > { %v1918_v19 = vpop.f32.mrf.mxu1 }
 0x5cc   : > { %v1919_v57 = vadd.f32 %v1918_v19, %v1832_v35  ;;  %1934 = vadd.xlane.f32.xlu0 %v1930_v30  ;;  %v1933_v11 = vadd.f32 %v3849_v9, %v1927_v58 }
 0x5ce   : > { %v1931_v1 = vadd.f32 %v3841_v41, %v1919_v57 }
 0x5d0   : > { %1936 = vadd.xlane.f32.xlu1 %v1931_v1  ;;  %1938 = vadd.xlane.f32.xlu0 %v1932_v7 }
 0x5d4   : > { %1940 = vadd.xlane.f32.xlu0 %v1933_v11 }
 0x655   : > { %v1935_v17 = vpop.xlane.xlu0 %1934 }
 0x656   : > { %v1943_v15 = vmul.f32 0.0078125, %v1935_v17 }
 0x658   : > { %v3854_v42 = vsub.f32 %v1930_v30, %v1943_v15 }
 0x659   : > { %v1937_v50 = vpop.xlane.xlu1 %1936  ;;  %v1939_v18 = vpop.xlane.xlu0 %1938 }
 0x65a   : > { %v1944_v21 = vmul.f32 0.0078125, %v1937_v50  ;;  %v1945_v22 = vmul.f32 0.0078125, %v1939_v18  ;;  %v1951_v23 = vmul.f32 %v3854_v42, %v3854_v42  ;;  %v1990_v18 = vrot.slane %v3833_v48, %v1989_v14 }
 0x65c   : > { %v3858_v24 = vsub.f32 %v1931_v1, %v1944_v21  ;;  %v3860_v10 = vsub.f32 %v1932_v7, %v1945_v22  ;;  %1955 = vadd.xlane.f32.xlu1 %v1951_v23  ;;  %v1981_v1 = vsub.s32 1, %v3829_v3 }
 0x65d   : > { %v1941_v60 = vpop.xlane.xlu0 %1940 }
 0x65e   : > { %v1946_v49 = vmul.f32 0.0078125, %v1941_v60  ;;  %v1952_v28 = vmul.f32 %v3858_v24, %v3858_v24  ;;  %v1953_v55 = vmul.f32 %v3860_v10, %v3860_v10  ;;  %v1982_v12 = vrot.slane %v3833_v48, %v1981_v1 }
 0x660   : > { %v3866_v47 = vsub.f32 %v1933_v11, %v1946_v49  ;;  %1957 = vadd.xlane.f32.xlu0 %v1952_v28  ;;  %1959 = vadd.xlane.f32.xlu1 %v1953_v55 }
 0x662   : > { %v1954_v29 = vmul.f32 %v3866_v47, %v3866_v47 }
 0x664   : > { %1961 = vadd.xlane.f32.xlu0 %v1954_v29 }
 0x6e5   : > { %v1956_v32 = vpop.xlane.xlu1 %1955 }
 0x6e6   : > { %v1963_v38 = vmul.f32 0.0078125, %v1956_v32 }
 0x6e8   : > { %v1967_v51 = vadd.f32 1e-05, %v1963_v38 }
 0x6e9   : > { %v1960_v35 = vpop.xlane.xlu1 %1959  ;;  %v1958_v52 = vpop.xlane.xlu0 %1957 }
 0x6ea   : > { %3197 = vrsqrt.f32 %v1967_v51  ;;  %v1965_v53 = vmul.f32 0.0078125, %v1960_v35  ;;  %v1964_v54 = vmul.f32 0.0078125, %v1958_v52 }
 0x6ec   : > { %v1968_v40 = vadd.f32 1e-05, %v1964_v54  ;;  %v1969_v30 = vadd.f32 1e-05, %v1965_v53 }
 0x6ed   : > { %v1962_v19 = vpop.xlane.xlu0 %1961 }
 0x6ee   : > { %v1966_v57 = vmul.f32 0.0078125, %v1962_v19  ;;  %3199 = vrsqrt.f32 %v1968_v40 }
 0x6ef   : > { %3201 = vrsqrt.f32 %v1969_v30 }
 0x6f0   : > { %v1970_v58 = vadd.f32 1e-05, %v1966_v57 }
 0x6f2   : > { %3203 = vrsqrt.f32 %v1970_v58 }
 0x6f7   : > { %v3198_v7 = vpop.eup %3197 }
 0x6f8   : > { %v1975_v11 = vmul.f32 %v3198_v7, %v3854_v42 }
 0x6fa   : > { %v1983_v50 = vmul.f32 %v1982_v12, %v1975_v11  ;;  %v2200_v11 = vsub.s32 4, %v3829_v3 }
 0x6fb   : > { %v3200_v17 = vpop.eup %3199 }
 0x6fc   : > { %v1976_v15 = vmul.f32 %v3200_v17, %v3858_v24  ;;  %v3202_v21 = vpop.eup %3201  ;;  %v1991_v49 = vadd.f32 %v1990_v18, %v1983_v50  ;;  %v2201_v14 = vrot.slane %v3833_v48, %v2200_v11 }
 0x6fd   : > { %v1977_v28 = vmul.f32 %v3202_v21, %v3860_v10  ;;  %v3131_v10 = vld [vmem:[%s3465_s30 + $0x40] sm:$0xff]  }
 0x6fe   : > { %v1984_v23 = vmul.f32 %v1982_v12, %v1976_v15 }
 0x6ff   : > { %v3204_v22 = vpop.eup %3203  ;;  %v1985_v24 = vmul.f32 %v1982_v12, %v1977_v28 }
 0x700   : > { %v1978_v60 = vmul.f32 %v3204_v22, %v3866_v47  ;;  %v1992_v42 = vadd.f32 %v1990_v18, %v1984_v23  ;;  %v3127_v47 = vld [vmem:[%s3465_s30 + $0x50] sm:$0xff]  }
 0x701   : > { %v1993_v36 = vadd.f32 %v1990_v18, %v1985_v24  ;;  %2729 = vmatprep.subr.bf16.mxu1 %v3127_v47 }
 0x702   : > { %v1995_v55 = vpack.c.bf16 %v1992_v42, %v1991_v49  ;;  %v1986_v29 = vmul.f32 %v1982_v12, %v1978_v60  ;;  %2730 = vmatpush3.bf16.msra.mxu1 %v3128_v31 }
 0x703   : > { %2731 = vmatprep.subr.bf16.mxu1 %v3129_v16 }
 0x704   : > { %2134 = vmatmul.mubr.bf16.vlgmr.msra.gmra.mxu0 %v1995_v55  ;;  %v1994_v13 = vadd.f32 %v1990_v18, %v1986_v29 }
 0x705   : > { %2143 = vmatprep.mubr.bf16.mxu0 %v3316_v6  ;;  %v1812_v6 = vld [vmem:[%s3470_s8 + $0x8] sm:$0xff] }
 0x706   : > { %v1996_v59 = vpack.c.bf16 %v1994_v13, %v1993_v36  ;;  %2732 = vmatpush3.bf16.msra.mxu1 %v3130_v33  ;;  %v2020_v0 = vrot.slane %v1812_v6, %v2015_v20 }
 0x707   : > { %2733 = vmatprep.subr.bf16.mxu1 %v3131_v10 }
 0x70a   : > { %2734 = vmatpush3.bf16.msra.mxu1 %v3132_v34 }
 0x70c   : > { %2144 = vmatmul.mubr.bf16.gmra.mxu0 %v1996_v59 }
 0x7c4   : > { %v2135_v37 = vpop.f32.mrf.mxu0 }
 0x7c5   : > { %v2136_v27 = vadd.f32 %v2135_v37, %v2016_v62 }
 0x7c6   : > { %v2137_v63 = vpop.f32.mrf.mxu0 }
 0x7c7   : > { %v2138_v2 = vadd.f32 %v2137_v63, %v2020_v0  ;;  %v2154_v45 = vmax.f32 %v2136_v27, 0.0 }
 0x7c8   : > { %v2139_v4 = vpop.f32.mrf.mxu0 }
 0x7c9   : > { %v2140_v8 = vadd.f32 %v2139_v4, %v2016_v62  ;;  %v2155_v43 = vmax.f32 %v2138_v2, 0.0 }
 0x7ca   : > { %v2141_v61 = vpop.f32.mrf.mxu0 }
 0x7cb   : > { %v2142_v25 = vadd.f32 %v2141_v61, %v2020_v0  ;;  %v2156_v26 = vmax.f32 %v2140_v8, 0.0 }
 0x7cc   : > { %v2145_v39 = vpop.f32.mrf.mxu0 }
 0x7cd   : > { %v2157_v44 = vmax.f32 %v2142_v25, 0.0  ;;  %v2162_v38 = vpack.c.bf16 %v2156_v26, %v2154_v45  ;;  %v2146_v53 = vadd.f32 %v2145_v39, %v2016_v62 }
 0x7ce   : > { %v2147_v46 = vpop.f32.mrf.mxu0 }
 0x7cf   : > { %v2163_v32 = vpack.c.bf16 %v2157_v44, %v2155_v43  ;;  %v2148_v35 = vadd.f32 %v2147_v46, %v2020_v0  ;;  %v2158_v58 = vmax.f32 %v2146_v53, 0.0 }
 0x7d0   : > { %v2149_v51 = vpop.f32.mrf.mxu0 }
 0x7d1   : > { %v2150_v52 = vadd.f32 %v2149_v51, %v2016_v62  ;;  %2330 = vmatprep.mubr.bf16.mxu1 %v2163_v32  ;;  %v2159_v19 = vmax.f32 %v2148_v35, 0.0  ;;  %v2397_v32 = vsub.s32 5, %v3829_v3  ;;  %v2405_v51 = vsub.s32 6, %v3829_v3 }
 0x7d2   : > { %v2151_v54 = vpop.f32.mrf.mxu0  ;;  %2331 = vmatmul.mubr.bf16.vlgmr.msra.gmra.mxu1 %v2162_v38 }
 0x7d3   : > { %v2152_v40 = vadd.f32 %v2151_v54, %v2020_v0  ;;  %v2160_v30 = vmax.f32 %v2150_v52, 0.0  ;;  %v2398_v52 = vrot.slane %v3833_v48, %v2397_v32  ;;  %v2406_v54 = vrot.slane %v3833_v48, %v2405_v51 }
 0x7d5   : > { %v2161_v57 = vmax.f32 %v2152_v40, 0.0  ;;  %v2164_v7 = vpack.c.bf16 %v2160_v30, %v2158_v58 }
 0x7d7   : > { %v2165_v1 = vpack.c.bf16 %v2161_v57, %v2159_v19 }
 0x7d9   : > { %2338 = vmatprep.mubr.bf16.mxu1 %v2165_v1 }
 0x7da   : > { %2339 = vmatmul.mubr.bf16.gmra.mxu1 %v2164_v7 }
 0x892   : > { %v2735_v12 = vpop.f32.mrf.mxu1 }
 0x894   : > { %v2736_v17 = vpop.f32.mrf.mxu1 }
 0x895   : > { %v2737_v15 = vadd.f32 %v2736_v17, %v2735_v12 }
 0x896   : > { %v2738_v50 = vpop.f32.mrf.mxu1 }
 0x897   : > { %v2333_v18 = vadd.f32 %v2737_v15, %v2201_v14 }
 0x898   : > { %v2739_v21 = vpop.f32.mrf.mxu1 }
 0x899   : > { %v2740_v22 = vadd.f32 %v2739_v21, %v2738_v50  ;;  %v2347_v23 = vadd.f32 %v3837_v56, %v2333_v18 }
 0x89a   : > { %v2741_v60 = vpop.f32.mrf.mxu1 }
 0x89b   : > { %v2336_v49 = vadd.f32 %v2740_v22, %v2201_v14  ;;  %2351 = vadd.xlane.f32.xlu1 %v2347_v23 }
 0x89c   : > { %v2742_v42 = vpop.f32.mrf.mxu1 }
 0x89d   : > { %v2743_v28 = vadd.f32 %v2742_v42, %v2741_v60  ;;  %v2348_v55 = vadd.f32 %v3841_v41, %v2336_v49 }
 0x89e   : > { %v2744_v29 = vpop.f32.mrf.mxu1 }
 0x89f   : > { %v2341_v24 = vadd.f32 %v2743_v28, %v2201_v14  ;;  %2353 = vadd.xlane.f32.xlu0 %v2348_v55 }
 0x8a0   : > { %v2745_v13 = vpop.f32.mrf.mxu1 }
 0x8a1   : > { %v2746_v36 = vadd.f32 %v2745_v13, %v2744_v29  ;;  %v2349_v59 = vadd.f32 %v3845_v5, %v2341_v24 }
 0x8a3   : > { %v2344_v47 = vadd.f32 %v2746_v36, %v2201_v14  ;;  %2355 = vadd.xlane.f32.xlu1 %v2349_v59 }
 0x8a5   : > { %v2350_v31 = vadd.f32 %v3849_v9, %v2344_v47 }
 0x8a7   : > { %2357 = vadd.xlane.f32.xlu0 %v2350_v31 }
 0x924   : > { %v2352_v56 = vpop.xlane.xlu1 %2351 }
 0x925   : > { %v2359_v16 = vmul.f32 0.0078125, %v2352_v56 }
 0x927   : > { %v2363_v33 = vsub.f32 %v2347_v23, %v2359_v16 }
 0x928   : > { %v2354_v10 = vpop.xlane.xlu0 %2353 }
 0x929   : > { %v2360_v34 = vmul.f32 0.0078125, %v2354_v10  ;;  %v2367_v20 = vmul.f32 %v2363_v33, %v2363_v33 }
 0x92b   : > { %v2364_v6 = vsub.f32 %v2348_v55, %v2360_v34  ;;  %2371 = vadd.xlane.f32.xlu1 %v2367_v20 }
 0x92c   : > { %v2356_v41 = vpop.xlane.xlu1 %2355 }
 0x92d   : > { %v2361_v37 = vmul.f32 0.0078125, %v2356_v41  ;;  %v2368_v0 = vmul.f32 %v2364_v6, %v2364_v6 }
 0x92f   : > { %v2365_v62 = vsub.f32 %v2349_v59, %v2361_v37  ;;  %2373 = vadd.xlane.f32.xlu0 %v2368_v0 }
 0x930   : > { %v2358_v63 = vpop.xlane.xlu0 %2357 }
 0x931   : > { %v2362_v5 = vmul.f32 0.0078125, %v2358_v63  ;;  %v2369_v4 = vmul.f32 %v2365_v62, %v2365_v62 }
 0x933   : > { %v2366_v2 = vsub.f32 %v2350_v31, %v2362_v5  ;;  %2375 = vadd.xlane.f32.xlu1 %v2369_v4 }
 0x935   : > { %v2370_v9 = vmul.f32 %v2366_v2, %v2366_v2 }
 0x937   : > { %2377 = vadd.xlane.f32.xlu0 %v2370_v9 }
 0x9b4   : > { %v2372_v8 = vpop.xlane.xlu1 %2371 }
 0x9b5   : > { %v2379_v27 = vmul.f32 0.0078125, %v2372_v8 }
 0x9b7   : > { %v2383_v61 = vadd.f32 1e-05, %v2379_v27 }
 0x9b8   : > { %v2374_v25 = vpop.xlane.xlu0 %2373 }
 0x9b9   : > { %3205 = vrsqrt.f32 %v2383_v61  ;;  %v2380_v26 = vmul.f32 0.0078125, %v2374_v25 }
 0x9bb   : > { %v2384_v39 = vadd.f32 1e-05, %v2380_v26 }
 0x9bc   : > { %v2376_v43 = vpop.xlane.xlu1 %2375 }
 0x9bd   : > { %3207 = vrsqrt.f32 %v2384_v39  ;;  %v2381_v44 = vmul.f32 0.0078125, %v2376_v43 }
 0x9bf   : > { %v2385_v45 = vadd.f32 1e-05, %v2381_v44 }
 0x9c0   : > { %v2378_v46 = vpop.xlane.xlu0 %2377 }
 0x9c1   : > { %3209 = vrsqrt.f32 %v2385_v45  ;;  %v2382_v38 = vmul.f32 0.0078125, %v2378_v46 }
 0x9c3   : > { %v2386_v35 = vadd.f32 1e-05, %v2382_v38 }
 0x9c5   : > { %3211 = vrsqrt.f32 %v2386_v35 }
 0x9c6   : > { %v3206_v53 = vpop.eup %3205 }
 0x9c7   : > { %v2391_v40 = vmul.f32 %v3206_v53, %v2363_v33 }
 0x9c9   : > { %v2399_v30 = vmul.f32 %v2398_v52, %v2391_v40 }
 0x9ca   : > { %v3208_v19 = vpop.eup %3207 }
 0x9cb   : > { %v2407_v57 = vadd.f32 %v2406_v54, %v2399_v30  ;;  %v2392_v58 = vmul.f32 %v3208_v19, %v2364_v6 }
 0x9cd   : > { %2411 = vst [vmem:[%s3475_s10] sm:$0xff] %v2407_v57  ;;  %v2400_v1 = vmul.f32 %v2398_v52, %v2392_v58 }
 0x9ce   : > { %v3210_v7 = vpop.eup %3209 }
 0x9cf   : > { %v2408_v11 = vadd.f32 %v2406_v54, %v2400_v1  ;;  %v2393_v3 = vmul.f32 %v3210_v7, %v2365_v62 }
 0x9d1   : > { %2412 = vst [vmem:[%s3475_s10 + $0x8] sm:$0xff] %v2408_v11  ;;  %v2401_v12 = vmul.f32 %v2398_v52, %v2393_v3 }
 0x9d2   : > { %v3212_v14 = vpop.eup %3211 }
 0x9d3   : > { %v2409_v17 = vadd.f32 %v2406_v54, %v2401_v12  ;;  %v2394_v15 = vmul.f32 %v3212_v14, %v2366_v2 }
 0x9d5   : > { %2413 = vst [vmem:[%s3475_s10 + $0x10] sm:$0xff] %v2409_v17  ;;  %v2402_v50 = vmul.f32 %v2398_v52, %v2394_v15 }
 0x9d7   : > { %v2410_v48 = vadd.f32 %v2406_v54, %v2402_v50 }
 0x9d9   : > { %2414 = vst [vmem:[%s3475_s10 + $0x18] sm:$0xff] %v2410_v48 }
 0x9da PF: > { %s19_s28 = sadd.s32 1, %s3311_s28   ;;  %s3971_s24 = sld [smem:[#allocation5_spill]] }
 0x9db   : > { %p16_p11 = scmp.ge.s32.totalorder %s19_s28, 6   ;;  %s3972_s25 = sld [smem:[#allocation6_spill]] }
 0x9dc   : > { %s3973_s26 = sld [smem:[#allocation7_spill]]  ;;  %s3975_s21 = smov %s3287_s22 }
 0x9dd   : > { %s3974_s27 = sld [smem:[#allocation8_spill]]  ;;  %s3976_s22 = smov %s3291_s23 }
 0x9de   : > { %s3977_s23 = smov %s3415_s11  ;;  %18 = sbr.rel (!%p16_p11) target bundleno = 8 (0x8), region = 103 }
 0x9e3   :  { %2439 = vsyncpa [#allocation3], 1 }
 0x9e4   :  { %2441 = vsyncpa [#allocation3 + $0x1], 1 }

</bundles_post_ra>
